<compile_context>
chip_gen: v7x
topology: tpu7x:2x2x1
jax: 0.10.0
libtpu: 0.0.40
codegen_flags: <defaults>
</compile_context>

<pallas_src>
import math
import numpy as np
import jax
import jax.numpy as jnp
from jax import lax
from jax.experimental import pallas as pl
from jax.experimental.pallas import tpu as pltpu

# ---------------- configuration (small shapes consistent with the module) ----------------
B = 2            # batch
IMG_CH = 3       # img_channels
TMP_CH = 8       # tmp_channels (== in_channels of conv0/conv1/skip)
OUT_CH = 16      # out_channels
RES = 16         # resolution
RES2 = RES // 2
HW = RES * RES           # 256
HW2 = RES2 * RES2        # 64
NLANE = B * HW           # 512  (batch folded onto lanes, full res)
NLANE2 = B * HW2         # 128  (batch folded onto lanes, half res)

LRELU_SLOPE = 0.2
LRELU_GAIN = math.sqrt(2.0)          # bias_act lrelu def_gain
CONV_CLAMP = 256.0
DOWN_GAIN = math.sqrt(0.5)           # gain passed to conv1 / skip in the resnet branch
CONV1_ACT_GAIN = LRELU_GAIN * DOWN_GAIN      # = 1.0
CONV1_CLAMP = CONV_CLAMP * DOWN_GAIN

TAPS3 = tuple((dy, dx) for dy in (-1, 0, 1) for dx in (-1, 0, 1))        # 3x3 tap offsets
PHASES = tuple((ry, rx) for ry in (0, 1) for rx in (0, 1))               # stride-2 phases

# normalized [1,3,3,1] resample filter (separable, sums to 1)
_F1 = np.array([1.0, 3.0, 3.0, 1.0], np.float64)
_F1 /= _F1.sum()
F4 = np.outer(_F1, _F1).astype(np.float32)                               # (4, 4)

# ---------------- host-precomputed structural constants (perf feedback: none of this in-kernel) ----
# conv1: effective kernel = (3x3 weight) convolved with the 4x4 blur, stride 2, pad 2.
# Re-indexed to (tap dy,dx on the half-res grid) x (phase ry,rx):  fy = 2*dy+2+ry-ky, fx = 2*dx+2+rx-kx.
M1P = np.zeros((3, 3, 9, 4), np.float32)
for _t, (_dy, _dx) in enumerate(TAPS3):
    for _p, (_ry, _rx) in enumerate(PHASES):
        _u, _v = 2 * _dy + 2 + _ry, 2 * _dx + 2 + _rx
        for _ky in range(3):
            for _kx in range(3):
                _fy, _fx = _u - _ky, _v - _kx
                if 0 <= _fy < 4 and 0 <= _fx < 4:
                    M1P[_ky, _kx, _t, _p] = F4[_fy, _fx]

# space-to-depth routing matrix for x1: full-res lane -> phase-major half-res lane (exact 0/1).
PSEL_NP = np.zeros((NLANE, NLANE), np.float32)
for _b in range(B):
    for _y in range(RES):
        for _x in range(RES):
            _n = _b * HW + _y * RES + _x
            _p = (_y % 2) * 2 + (_x % 2)
            PSEL_NP[_n, _p * NLANE2 + _b * HW2 + (_y // 2) * RES2 + (_x // 2)] = 1.0

# skip path: [1,3,3,1] blur (pad 1, zero-padded borders, no renorm) + stride-2 downsample as a
# (full-res lane) x (half-res lane) matrix.  Applied to the *fromrgb* output x0.
BMAT_NP = np.zeros((NLANE, NLANE2), np.float32)
for _b in range(B):
    for _y in range(RES):
        for _x in range(RES):
            _n = _b * HW + _y * RES + _x
            for _Y in range(RES2):
                _fy = _y - 2 * _Y + 1
                if not (0 <= _fy < 4):
                    continue
                for _X in range(RES2):
                    _fx = _x - 2 * _X + 1
                    if not (0 <= _fx < 4):
                        continue
                    BMAT_NP[_n, _b * HW2 + _Y * RES2 + _X] = F4[_fy, _fx]


def _border_masks(res, nlane):
    hw = res * res
    m = np.zeros((9, nlane), np.float32)
    for t, (dy, dx) in enumerate(TAPS3):
        for n in range(nlane):
            y = (n % hw) // res
            x = n % res
            if 0 <= y + dy < res and 0 <= x + dx < res:
                m[t, n] = 1.0
    return m


MASK0_NP = _border_masks(RES, NLANE)      # (9, 512) per-tap border masks, full res
MASK1_NP = _border_masks(RES2, NLANE2)    # (9, 128) per-tap border masks, half res

VMEM_SPEC = pl.BlockSpec(memory_space=pltpu.MemorySpace.VMEM)
HIGH = jax.lax.Precision.HIGHEST


def _bias_lrelu_clamp(x, b, gain, clamp):
    x = x + b
    x = jnp.where(x >= 0.0, x, LRELU_SLOPE * x)
    x = x * gain
    return jnp.clip(x, -clamp, clamp)


# ---------------- the single fused kernel ----------------
def disc_block_kernel(img_ref, wrgb_ref, brgb_ref, w0_ref, b0_ref, w1_ref, b1_ref,
                      ws_ref, psel_ref, bmat_ref, mask0_ref, mask1_ref,
                      out_ref, op0_ref, op1_ref):
    f32 = jnp.float32

    # ---- fromrgb: 1x1 conv + bias + lrelu*sqrt(2) + clamp  (activations are (C, B*H*W)) ----
    x0 = jnp.dot(wrgb_ref[...], img_ref[...], preferred_element_type=f32)      # (8, 512)
    x0 = _bias_lrelu_clamp(x0, brgb_ref[...], LRELU_GAIN, CONV_CLAMP)

    # ---- resnet skip branch: acts on the fromrgb output x0 ----
    # blur + stride-2 downsample folded into BMAT, then 1x1 conv (linear; weight gain and the
    # sqrt(0.5) branch gain are folded into ws).
    xb = jnp.dot(x0, bmat_ref[...], preferred_element_type=f32)                # (8, 128)
    y_skip = jnp.dot(ws_ref[...], xb, preferred_element_type=f32)              # (16, 128)

    # ---- conv0: 9 shifted taps (lane roll + precomputed border mask) -> one K=72 MXU matmul ----
    for t, (dy, dx) in enumerate(TAPS3):
        if dy == 0 and dx == 0:
            op0_ref[t * TMP_CH:(t + 1) * TMP_CH, :] = x0
        else:
            shifted = pltpu.roll(x0, shift=(-(dy * RES + dx)) % NLANE, axis=1)
            op0_ref[t * TMP_CH:(t + 1) * TMP_CH, :] = shifted * mask0_ref[t:t + 1, :]
    x1 = jnp.dot(w0_ref[...], op0_ref[...], preferred_element_type=f32)        # (8, 512)
    x1 = _bias_lrelu_clamp(x1, b0_ref[...], LRELU_GAIN, CONV_CLAMP)

    # ---- stride-2 space-to-depth of x1 via the precomputed bf16 routing matrix (0/1 exact) ----
    phw = jnp.dot(x1, psel_ref[...].astype(f32), preferred_element_type=f32)   # (8, 4*128)
    ph = jnp.concatenate(
        [phw[:, p * NLANE2:(p + 1) * NLANE2] for p in range(4)], axis=0)       # (32, 128)

    # ---- conv1 (blur + 3x3 stride-2 folded into per-(tap, phase) weights): taps on the 8x8 grid ----
    for t, (dy, dx) in enumerate(TAPS3):
        if dy == 0 and dx == 0:
            op1_ref[t * 4 * TMP_CH:(t + 1) * 4 * TMP_CH, :] = ph
        else:
            shifted = pltpu.roll(ph, shift=(-(dy * RES2 + dx)) % NLANE2, axis=1)
            op1_ref[t * 4 * TMP_CH:(t + 1) * 4 * TMP_CH, :] = shifted * mask1_ref[t:t + 1, :]
    y1 = jnp.dot(w1_ref[...], op1_ref[...], preferred_element_type=f32)        # (16, 128)
    y1 = y1 + b1_ref[...]
    y1 = jnp.where(y1 >= 0.0, y1, LRELU_SLOPE * y1) * CONV1_ACT_GAIN
    y1 = jnp.clip(y1, -CONV1_CLAMP, CONV1_CLAMP)

    # ---- resnet: out = skip + conv1 ----
    out_ref[...] = y_skip + y1


# ---------------- one-time parameter folding (hoisted out of the per-forward jit) ----------------
def prepare_inputs(params):
    g_rgb = 1.0 / math.sqrt(IMG_CH * 1 * 1)
    g0 = 1.0 / math.sqrt(TMP_CH * 3 * 3)
    g1 = 1.0 / math.sqrt(TMP_CH * 3 * 3)
    gs = 1.0 / math.sqrt(TMP_CH * 1 * 1)

    wrgb = jnp.asarray(params['rgb_w']).reshape(TMP_CH, IMG_CH) * g_rgb
    brgb = jnp.asarray(params['rgb_b']).reshape(TMP_CH, 1)

    w0 = jnp.asarray(params['c0_w']) * g0                                      # (TMP, TMP, 3, 3)
    w0flat = jnp.transpose(w0, (0, 2, 3, 1)).reshape(TMP_CH, 9 * TMP_CH)       # col = tap*C + c
    b0 = jnp.asarray(params['c0_b']).reshape(TMP_CH, 1)

    # conv1: fold the [1,3,3,1] blur into an effective stride-2 kernel, laid out per (tap, phase, cin)
    w1 = jnp.asarray(params['c1_w']) * g1                                      # (OUT, TMP, 3, 3)
    w1flat = jnp.einsum('ocij,ijtp->otpc', w1, jnp.asarray(M1P),
                        precision=HIGH).reshape(OUT_CH, 36 * TMP_CH)
    b1 = jnp.asarray(params['c1_b']).reshape(OUT_CH, 1)

    # skip: linear activation -> fold the sqrt(0.5) gain into the weights
    ws = jnp.asarray(params['skip_w']).reshape(OUT_CH, TMP_CH) * (gs * DOWN_GAIN)

    psel = jnp.asarray(PSEL_NP, dtype=jnp.bfloat16)    # exact 0/1 routing matrix, bf16 storage
    bmat = jnp.asarray(BMAT_NP)
    mask0 = jnp.asarray(MASK0_NP)
    mask1 = jnp.asarray(MASK1_NP)
    return (wrgb, brgb, w0flat, b0, w1flat, b1, ws, psel, bmat, mask0, mask1)


@jax.jit
def disc_block_forward(img, folded):
    """DiscriminatorBlock('resnet', in_channels=0) forward.  Returns (x, img) with img=None."""
    (wrgb, brgb, w0flat, b0, w1flat, b1, ws, psel, bmat, mask0, mask1) = folded
    img2d = jnp.transpose(img, (1, 0, 2, 3)).reshape(IMG_CH, NLANE)            # (C, B*H*W)

    out2d = pl.pallas_call(
        disc_block_kernel,
        out_shape=jax.ShapeDtypeStruct((OUT_CH, NLANE2), jnp.float32),
        in_specs=[VMEM_SPEC] * 12,
        out_specs=VMEM_SPEC,
        scratch_shapes=[
            pltpu.VMEM((9 * TMP_CH, NLANE), jnp.float32),      # conv0 tap stack   (72, 512)
            pltpu.VMEM((36 * TMP_CH, NLANE2), jnp.float32),    # conv1 tap stack   (288, 128)
        ],
    )(img2d, wrgb, brgb, w0flat, b0, w1flat, b1, ws, psel, bmat, mask0, mask1)

    x = out2d.reshape(OUT_CH, B, RES2, RES2).transpose(1, 0, 2, 3)             # (B, OUT, 8, 8)
    return x, None


# ---------------- pure-JAX reference (mirrors Conv2dLayer / conv2d_resample / bias_act) ----------------
def _conv2d_ref(x, w, stride=1, padding=0):
    return lax.conv_general_dilated(
        x, w, (stride, stride), ((padding, padding), (padding, padding)),
        dimension_numbers=('NCHW', 'OIHW', 'NCHW'), precision=HIGH)


def _blur_ref(x, down=1, pad=(0, 0, 0, 0)):
    px0, px1, py0, py1 = pad
    x = jnp.pad(x, ((0, 0), (0, 0), (py0, py1), (px0, px1)))
    c = x.shape[1]
    f = jnp.tile(jnp.asarray(F4)[None, None], (c, 1, 1, 1))
    x = lax.conv_general_dilated(
        x, f, (1, 1), 'VALID', dimension_numbers=('NCHW', 'OIHW', 'NCHW'),
        feature_group_count=c, precision=HIGH)
    return x[:, :, ::down, ::down]


def _conv_layer_ref(x, weight, bias, kernel_size, activation, down, conv_clamp, gain=1.0):
    wg = 1.0 / math.sqrt(weight.shape[1] * kernel_size ** 2)
    w = weight * wg
    padding = kernel_size // 2
    if down > 1:
        fw = 4
        p0 = padding + (fw - down + 1) // 2
        p1 = padding + (fw - down) // 2
        if kernel_size == 1:      # downsample first, then 1x1 conv
            x = _blur_ref(x, down=down, pad=(p0, p1, p0, p1))
            x = _conv2d_ref(x, w)
        else:                     # blur, then strided conv
            x = _blur_ref(x, down=1, pad=(p0, p1, p0, p1))
            x = _conv2d_ref(x, w, stride=down)
    else:
        x = _conv2d_ref(x, w, padding=padding)
    def_gain = math.sqrt(2.0) if activation == 'lrelu' else 1.0
    act_gain = def_gain * gain
    act_clamp = conv_clamp * gain if conv_clamp is not None else None
    if bias is not None:
        x = x + bias.reshape(1, -1, 1, 1)
    if activation == 'lrelu':
        x = jnp.where(x >= 0.0, x, LRELU_SLOPE * x)
    x = x * act_gain
    if act_clamp is not None:
        x = jnp.clip(x, -act_clamp, act_clamp)
    return x


def ref_forward(img, params):
    x = _conv_layer_ref(img, params['rgb_w'], params['rgb_b'], 1, 'lrelu', 1, CONV_CLAMP)
    y = _conv_layer_ref(x, params['skip_w'], None, 1, 'linear', 2, None, gain=DOWN_GAIN)
    x = _conv_layer_ref(x, params['c0_w'], params['c0_b'], 3, 'lrelu', 1, CONV_CLAMP)
    x = _conv_layer_ref(x, params['c1_w'], params['c1_b'], 3, 'lrelu', 2, CONV_CLAMP, gain=DOWN_GAIN)
    return y + x, None


if __name__ == "__main__":
    key = jax.random.PRNGKey(0)
    ks = jax.random.split(key, 8)
    params = {
        'rgb_w': jax.random.normal(ks[0], (TMP_CH, IMG_CH, 1, 1), jnp.float32),
        'rgb_b': 0.1 * jax.random.normal(ks[1], (TMP_CH,), jnp.float32),
        'c0_w': jax.random.normal(ks[2], (TMP_CH, TMP_CH, 3, 3), jnp.float32),
        'c0_b': 0.1 * jax.random.normal(ks[3], (TMP_CH,), jnp.float32),
        'c1_w': jax.random.normal(ks[4], (OUT_CH, TMP_CH, 3, 3), jnp.float32),
        'c1_b': 0.1 * jax.random.normal(ks[5], (OUT_CH,), jnp.float32),
        'skip_w': jax.random.normal(ks[6], (OUT_CH, TMP_CH, 1, 1), jnp.float32),
    }
    img = jax.random.normal(ks[7], (B, IMG_CH, RES, RES), jnp.float32)

    folded = prepare_inputs(params)           # one-time weight folding, outside the jitted forward
    x_out, img_out = disc_block_forward(img, folded)
    x_out = jax.block_until_ready(x_out)
    assert x_out.shape == (B, OUT_CH, RES2, RES2)
    assert img_out is None

    x_ref, _ = ref_forward(img, params)
    # tolerance allows for reduced-precision f32 MXU passes; genuine logic errors are >= 1e-1 here.
    max_err = float(jnp.max(jnp.abs(x_out - x_ref)))
    if not max_err < 3e-2:
        raise AssertionError(f"kernel/reference mismatch, max abs err = {max_err}")
    print("KERNEL_OK")
</pallas_src>

<mosaic_0001>
module attributes {stable_mosaic.version = 11 : i64} {
  func.func @disc_block_kernel(%arg0: memref<3x512xf32, #tpu.memory_space<vmem>>, %arg1: memref<8x3xf32, #tpu.memory_space<vmem>>, %arg2: memref<8x1xf32, #tpu.memory_space<vmem>>, %arg3: memref<8x72xf32, #tpu.memory_space<vmem>>, %arg4: memref<8x1xf32, #tpu.memory_space<vmem>>, %arg5: memref<16x288xf32, #tpu.memory_space<vmem>>, %arg6: memref<16x1xf32, #tpu.memory_space<vmem>>, %arg7: memref<16x8xf32, #tpu.memory_space<vmem>>, %arg8: memref<512x512xbf16, #tpu.memory_space<vmem>>, %arg9: memref<512x128xf32, #tpu.memory_space<vmem>>, %arg10: memref<9x512xf32, #tpu.memory_space<vmem>>, %arg11: memref<9x128xf32, #tpu.memory_space<vmem>>, %arg12: memref<16x128xf32, #tpu.memory_space<vmem>>, %arg13: memref<72x512xf32, #tpu.memory_space<vmem>>, %arg14: memref<288x128xf32, #tpu.memory_space<vmem>>) attributes {dimension_semantics = [], scalar_prefetch = 0 : i64, scratch_operands = 2 : i64, tpu.core_type = #tpu.core_type<tc>} {
    %c0 = arith.constant 0 : index
    %c0_0 = arith.constant 0 : index
    %0 = vector.load %arg1[%c0, %c0_0] : memref<8x3xf32, #tpu.memory_space<vmem>>, vector<8x3xf32>
    %c0_1 = arith.constant 0 : index
    %c0_2 = arith.constant 0 : index
    %1 = vector.load %arg0[%c0_1, %c0_2] : memref<3x512xf32, #tpu.memory_space<vmem>>, vector<3x512xf32>
    %cst = arith.constant dense<0.000000e+00> : vector<8x512xf32>
    %2 = tpu.matmul %0, %1, %cst {dimension_numbers = #tpu.dot_dimension_numbers<[1], [0], [0], [1], [0, 0, 1, 1], [], []>} : vector<8x3xf32>, vector<3x512xf32>, vector<8x512xf32> -> vector<8x512xf32>
    %c0_3 = arith.constant 0 : index
    %c0_4 = arith.constant 0 : index
    %3 = vector.load %arg2[%c0_3, %c0_4] : memref<8x1xf32, #tpu.memory_space<vmem>>, vector<8x1xf32>
    %4 = vector.broadcast %3 : vector<8x1xf32> to vector<8x512xf32>
    %5 = arith.addf %2, %4 : vector<8x512xf32>
    %cst_5 = arith.constant 0.000000e+00 : f32
    %6 = vector.broadcast %cst_5 : f32 to vector<8x512xf32>
    %7 = arith.cmpf oge, %5, %6 : vector<8x512xf32>
    %cst_6 = arith.constant 2.000000e-01 : f32
    %8 = vector.broadcast %cst_6 : f32 to vector<8x512xf32>
    %9 = arith.mulf %8, %5 : vector<8x512xf32>
    %10 = arith.select %7, %5, %9 : vector<8x512xi1>, vector<8x512xf32>
    %cst_7 = arith.constant 1.41421354 : f32
    %11 = vector.broadcast %cst_7 : f32 to vector<8x512xf32>
    %12 = arith.mulf %10, %11 : vector<8x512xf32>
    %cst_8 = arith.constant -2.560000e+02 : f32
    %cst_9 = arith.constant 2.560000e+02 : f32
    %13 = vector.broadcast %cst_8 : f32 to vector<8x512xf32>
    %14 = arith.maximumf %13, %12 : vector<8x512xf32>
    %15 = vector.broadcast %cst_9 : f32 to vector<8x512xf32>
    %16 = arith.minimumf %15, %14 : vector<8x512xf32>
    %c0_10 = arith.constant 0 : index
    %c0_11 = arith.constant 0 : index
    %17 = vector.load %arg9[%c0_10, %c0_11] : memref<512x128xf32, #tpu.memory_space<vmem>>, vector<512x128xf32>
    %cst_12 = arith.constant dense<0.000000e+00> : vector<8x128xf32>
    %18 = tpu.matmul %16, %17, %cst_12 {dimension_numbers = #tpu.dot_dimension_numbers<[1], [0], [0], [1], [0, 0, 1, 1], [], []>} : vector<8x512xf32>, vector<512x128xf32>, vector<8x128xf32> -> vector<8x128xf32>
    %c0_13 = arith.constant 0 : index
    %c0_14 = arith.constant 0 : index
    %19 = vector.load %arg7[%c0_13, %c0_14] : memref<16x8xf32, #tpu.memory_space<vmem>>, vector<16x8xf32>
    %cst_15 = arith.constant dense<0.000000e+00> : vector<16x128xf32>
    %20 = tpu.matmul %19, %18, %cst_15 {dimension_numbers = #tpu.dot_dimension_numbers<[1], [0], [0], [1], [0, 0, 1, 1], [], []>} : vector<16x8xf32>, vector<8x128xf32>, vector<16x128xf32> -> vector<16x128xf32>
    %c17_i32 = arith.constant 17 : i32
    %21 = tpu.dynamic_rotate %16 by %c17_i32 dim 1 : vector<8x512xf32>, i32 -> vector<8x512xf32>
    %c0_16 = arith.constant 0 : index
    %c0_17 = arith.constant 0 : index
    %22 = vector.load %arg10[%c0_16, %c0_17] : memref<9x512xf32, #tpu.memory_space<vmem>>, vector<1x512xf32>
    %23 = vector.broadcast %22 : vector<1x512xf32> to vector<8x512xf32>
    %24 = arith.mulf %21, %23 : vector<8x512xf32>
    %c0_18 = arith.constant 0 : index
    %c0_19 = arith.constant 0 : index
    %25 = vector.load %arg13[%c0_18, %c0_19] : memref<72x512xf32, #tpu.memory_space<vmem>>, vector<8x512xf32>
    tpu.vector_store %arg13[%c0_18, %c0_19], %24 {strides = array<i32>} : memref<72x512xf32, #tpu.memory_space<vmem>>, vector<8x512xf32>,
    %c16_i32 = arith.constant 16 : i32
    %26 = tpu.dynamic_rotate %16 by %c16_i32 dim 1 : vector<8x512xf32>, i32 -> vector<8x512xf32>
    %c1 = arith.constant 1 : index
    %c0_20 = arith.constant 0 : index
    %27 = vector.load %arg10[%c1, %c0_20] : memref<9x512xf32, #tpu.memory_space<vmem>>, vector<1x512xf32>
    %28 = vector.broadcast %27 : vector<1x512xf32> to vector<8x512xf32>
    %29 = arith.mulf %26, %28 : vector<8x512xf32>
    %c8 = arith.constant 8 : index
    %c0_21 = arith.constant 0 : index
    %30 = vector.load %arg13[%c8, %c0_21] : memref<72x512xf32, #tpu.memory_space<vmem>>, vector<8x512xf32>
    tpu.vector_store %arg13[%c8, %c0_21], %29 {strides = array<i32>} : memref<72x512xf32, #tpu.memory_space<vmem>>, vector<8x512xf32>,
    %c15_i32 = arith.constant 15 : i32
    %31 = tpu.dynamic_rotate %16 by %c15_i32 dim 1 : vector<8x512xf32>, i32 -> vector<8x512xf32>
    %c2 = arith.constant 2 : index
    %c0_22 = arith.constant 0 : index
    %32 = vector.load %arg10[%c2, %c0_22] : memref<9x512xf32, #tpu.memory_space<vmem>>, vector<1x512xf32>
    %33 = vector.broadcast %32 : vector<1x512xf32> to vector<8x512xf32>
    %34 = arith.mulf %31, %33 : vector<8x512xf32>
    %c16 = arith.constant 16 : index
    %c0_23 = arith.constant 0 : index
    %35 = vector.load %arg13[%c16, %c0_23] : memref<72x512xf32, #tpu.memory_space<vmem>>, vector<8x512xf32>
    tpu.vector_store %arg13[%c16, %c0_23], %34 {strides = array<i32>} : memref<72x512xf32, #tpu.memory_space<vmem>>, vector<8x512xf32>,
    %c1_i32 = arith.constant 1 : i32
    %36 = tpu.dynamic_rotate %16 by %c1_i32 dim 1 : vector<8x512xf32>, i32 -> vector<8x512xf32>
    %c3 = arith.constant 3 : index
    %c0_24 = arith.constant 0 : index
    %37 = vector.load %arg10[%c3, %c0_24] : memref<9x512xf32, #tpu.memory_space<vmem>>, vector<1x512xf32>
    %38 = vector.broadcast %37 : vector<1x512xf32> to vector<8x512xf32>
    %39 = arith.mulf %36, %38 : vector<8x512xf32>
    %c24 = arith.constant 24 : index
    %c0_25 = arith.constant 0 : index
    %40 = vector.load %arg13[%c24, %c0_25] : memref<72x512xf32, #tpu.memory_space<vmem>>, vector<8x512xf32>
    tpu.vector_store %arg13[%c24, %c0_25], %39 {strides = array<i32>} : memref<72x512xf32, #tpu.memory_space<vmem>>, vector<8x512xf32>,
    %c32 = arith.constant 32 : index
    %c0_26 = arith.constant 0 : index
    %41 = vector.load %arg13[%c32, %c0_26] : memref<72x512xf32, #tpu.memory_space<vmem>>, vector<8x512xf32>
    tpu.vector_store %arg13[%c32, %c0_26], %16 {strides = array<i32>} : memref<72x512xf32, #tpu.memory_space<vmem>>, vector<8x512xf32>,
    %c511_i32 = arith.constant 511 : i32
    %42 = tpu.dynamic_rotate %16 by %c511_i32 dim 1 : vector<8x512xf32>, i32 -> vector<8x512xf32>
    %c5 = arith.constant 5 : index
    %c0_27 = arith.constant 0 : index
    %43 = vector.load %arg10[%c5, %c0_27] : memref<9x512xf32, #tpu.memory_space<vmem>>, vector<1x512xf32>
    %44 = vector.broadcast %43 : vector<1x512xf32> to vector<8x512xf32>
    %45 = arith.mulf %42, %44 : vector<8x512xf32>
    %c40 = arith.constant 40 : index
    %c0_28 = arith.constant 0 : index
    %46 = vector.load %arg13[%c40, %c0_28] : memref<72x512xf32, #tpu.memory_space<vmem>>, vector<8x512xf32>
    tpu.vector_store %arg13[%c40, %c0_28], %45 {strides = array<i32>} : memref<72x512xf32, #tpu.memory_space<vmem>>, vector<8x512xf32>,
    %c497_i32 = arith.constant 497 : i32
    %47 = tpu.dynamic_rotate %16 by %c497_i32 dim 1 : vector<8x512xf32>, i32 -> vector<8x512xf32>
    %c6 = arith.constant 6 : index
    %c0_29 = arith.constant 0 : index
    %48 = vector.load %arg10[%c6, %c0_29] : memref<9x512xf32, #tpu.memory_space<vmem>>, vector<1x512xf32>
    %49 = vector.broadcast %48 : vector<1x512xf32> to vector<8x512xf32>
    %50 = arith.mulf %47, %49 : vector<8x512xf32>
    %c48 = arith.constant 48 : index
    %c0_30 = arith.constant 0 : index
    %51 = vector.load %arg13[%c48, %c0_30] : memref<72x512xf32, #tpu.memory_space<vmem>>, vector<8x512xf32>
    tpu.vector_store %arg13[%c48, %c0_30], %50 {strides = array<i32>} : memref<72x512xf32, #tpu.memory_space<vmem>>, vector<8x512xf32>,
    %c496_i32 = arith.constant 496 : i32
    %52 = tpu.dynamic_rotate %16 by %c496_i32 dim 1 : vector<8x512xf32>, i32 -> vector<8x512xf32>
    %c7 = arith.constant 7 : index
    %c0_31 = arith.constant 0 : index
    %53 = vector.load %arg10[%c7, %c0_31] : memref<9x512xf32, #tpu.memory_space<vmem>>, vector<1x512xf32>
    %54 = vector.broadcast %53 : vector<1x512xf32> to vector<8x512xf32>
    %55 = arith.mulf %52, %54 : vector<8x512xf32>
    %c56 = arith.constant 56 : index
    %c0_32 = arith.constant 0 : index
    %56 = vector.load %arg13[%c56, %c0_32] : memref<72x512xf32, #tpu.memory_space<vmem>>, vector<8x512xf32>
    tpu.vector_store %arg13[%c56, %c0_32], %55 {strides = array<i32>} : memref<72x512xf32, #tpu.memory_space<vmem>>, vector<8x512xf32>,
    %c495_i32 = arith.constant 495 : i32
    %57 = tpu.dynamic_rotate %16 by %c495_i32 dim 1 : vector<8x512xf32>, i32 -> vector<8x512xf32>
    %c8_33 = arith.constant 8 : index
    %c0_34 = arith.constant 0 : index
    %58 = vector.load %arg10[%c8_33, %c0_34] : memref<9x512xf32, #tpu.memory_space<vmem>>, vector<1x512xf32>
    %59 = vector.broadcast %58 : vector<1x512xf32> to vector<8x512xf32>
    %60 = arith.mulf %57, %59 : vector<8x512xf32>
    %c64 = arith.constant 64 : index
    %c0_35 = arith.constant 0 : index
    %61 = vector.load %arg13[%c64, %c0_35] : memref<72x512xf32, #tpu.memory_space<vmem>>, vector<8x512xf32>
    tpu.vector_store %arg13[%c64, %c0_35], %60 {strides = array<i32>} : memref<72x512xf32, #tpu.memory_space<vmem>>, vector<8x512xf32>,
    %c0_36 = arith.constant 0 : index
    %c0_37 = arith.constant 0 : index
    %62 = vector.load %arg3[%c0_36, %c0_37] : memref<8x72xf32, #tpu.memory_space<vmem>>, vector<8x72xf32>
    %c0_38 = arith.constant 0 : index
    %c0_39 = arith.constant 0 : index
    %63 = vector.load %arg13[%c0_38, %c0_39] : memref<72x512xf32, #tpu.memory_space<vmem>>, vector<72x512xf32>
    %cst_40 = arith.constant dense<0.000000e+00> : vector<8x512xf32>
    %64 = tpu.matmul %62, %63, %cst_40 {dimension_numbers = #tpu.dot_dimension_numbers<[1], [0], [0], [1], [0, 0, 1, 1], [], []>} : vector<8x72xf32>, vector<72x512xf32>, vector<8x512xf32> -> vector<8x512xf32>
    %c0_41 = arith.constant 0 : index
    %c0_42 = arith.constant 0 : index
    %65 = vector.load %arg4[%c0_41, %c0_42] : memref<8x1xf32, #tpu.memory_space<vmem>>, vector<8x1xf32>
    %66 = vector.broadcast %65 : vector<8x1xf32> to vector<8x512xf32>
    %67 = arith.addf %64, %66 : vector<8x512xf32>
    %cst_43 = arith.constant 0.000000e+00 : f32
    %68 = vector.broadcast %cst_43 : f32 to vector<8x512xf32>
    %69 = arith.cmpf oge, %67, %68 : vector<8x512xf32>
    %cst_44 = arith.constant 2.000000e-01 : f32
    %70 = vector.broadcast %cst_44 : f32 to vector<8x512xf32>
    %71 = arith.mulf %70, %67 : vector<8x512xf32>
    %72 = arith.select %69, %67, %71 : vector<8x512xi1>, vector<8x512xf32>
    %cst_45 = arith.constant 1.41421354 : f32
    %73 = vector.broadcast %cst_45 : f32 to vector<8x512xf32>
    %74 = arith.mulf %72, %73 : vector<8x512xf32>
    %cst_46 = arith.constant -2.560000e+02 : f32
    %cst_47 = arith.constant 2.560000e+02 : f32
    %75 = vector.broadcast %cst_46 : f32 to vector<8x512xf32>
    %76 = arith.maximumf %75, %74 : vector<8x512xf32>
    %77 = vector.broadcast %cst_47 : f32 to vector<8x512xf32>
    %78 = arith.minimumf %77, %76 : vector<8x512xf32>
    %c0_48 = arith.constant 0 : index
    %c0_49 = arith.constant 0 : index
    %79 = vector.load %arg8[%c0_48, %c0_49] : memref<512x512xbf16, #tpu.memory_space<vmem>>, vector<512x512xbf16>
    %80 = arith.extf %79 : vector<512x512xbf16> to vector<512x512xf32>
    %cst_50 = arith.constant dense<0.000000e+00> : vector<8x512xf32>
    %81 = tpu.matmul %78, %80, %cst_50 {dimension_numbers = #tpu.dot_dimension_numbers<[1], [0], [0], [1], [0, 0, 1, 1], [], []>} : vector<8x512xf32>, vector<512x512xf32>, vector<8x512xf32> -> vector<8x512xf32>
    %82 = vector.extract_strided_slice %81 {offsets = [0, 0], sizes = [8, 128], strides = [1, 1]} : vector<8x512xf32> to vector<8x128xf32>
    %83 = vector.extract_strided_slice %81 {offsets = [0, 128], sizes = [8, 128], strides = [1, 1]} : vector<8x512xf32> to vector<8x128xf32>
    %84 = vector.extract_strided_slice %81 {offsets = [0, 256], sizes = [8, 128], strides = [1, 1]} : vector<8x512xf32> to vector<8x128xf32>
    %85 = vector.extract_strided_slice %81 {offsets = [0, 384], sizes = [8, 128], strides = [1, 1]} : vector<8x512xf32> to vector<8x128xf32>
    %86 = tpu.concatenate %82, %83, %84, %85 in 0 : vector<8x128xf32>, vector<8x128xf32>, vector<8x128xf32>, vector<8x128xf32> -> vector<32x128xf32>
    %c9_i32 = arith.constant 9 : i32
    %87 = tpu.dynamic_rotate %86 by %c9_i32 dim 1 : vector<32x128xf32>, i32 -> vector<32x128xf32>
    %c0_51 = arith.constant 0 : index
    %c0_52 = arith.constant 0 : index
    %88 = vector.load %arg11[%c0_51, %c0_52] : memref<9x128xf32, #tpu.memory_space<vmem>>, vector<1x128xf32>
    %89 = vector.broadcast %88 : vector<1x128xf32> to vector<32x128xf32>
    %90 = arith.mulf %87, %89 : vector<32x128xf32>
    %c0_53 = arith.constant 0 : index
    %c0_54 = arith.constant 0 : index
    %91 = vector.load %arg14[%c0_53, %c0_54] : memref<288x128xf32, #tpu.memory_space<vmem>>, vector<32x128xf32>
    tpu.vector_store %arg14[%c0_53, %c0_54], %90 {strides = array<i32>} : memref<288x128xf32, #tpu.memory_space<vmem>>, vector<32x128xf32>,
    %c8_i32 = arith.constant 8 : i32
    %92 = tpu.dynamic_rotate %86 by %c8_i32 dim 1 : vector<32x128xf32>, i32 -> vector<32x128xf32>
    %c1_55 = arith.constant 1 : index
    %c0_56 = arith.constant 0 : index
    %93 = vector.load %arg11[%c1_55, %c0_56] : memref<9x128xf32, #tpu.memory_space<vmem>>, vector<1x128xf32>
    %94 = vector.broadcast %93 : vector<1x128xf32> to vector<32x128xf32>
    %95 = arith.mulf %92, %94 : vector<32x128xf32>
    %c32_57 = arith.constant 32 : index
    %c0_58 = arith.constant 0 : index
    %96 = vector.load %arg14[%c32_57, %c0_58] : memref<288x128xf32, #tpu.memory_space<vmem>>, vector<32x128xf32>
    tpu.vector_store %arg14[%c32_57, %c0_58], %95 {strides = array<i32>} : memref<288x128xf32, #tpu.memory_space<vmem>>, vector<32x128xf32>,
    %c7_i32 = arith.constant 7 : i32
    %97 = tpu.dynamic_rotate %86 by %c7_i32 dim 1 : vector<32x128xf32>, i32 -> vector<32x128xf32>
    %c2_59 = arith.constant 2 : index
    %c0_60 = arith.constant 0 : index
    %98 = vector.load %arg11[%c2_59, %c0_60] : memref<9x128xf32, #tpu.memory_space<vmem>>, vector<1x128xf32>
    %99 = vector.broadcast %98 : vector<1x128xf32> to vector<32x128xf32>
    %100 = arith.mulf %97, %99 : vector<32x128xf32>
    %c64_61 = arith.constant 64 : index
    %c0_62 = arith.constant 0 : index
    %101 = vector.load %arg14[%c64_61, %c0_62] : memref<288x128xf32, #tpu.memory_space<vmem>>, vector<32x128xf32>
    tpu.vector_store %arg14[%c64_61, %c0_62], %100 {strides = array<i32>} : memref<288x128xf32, #tpu.memory_space<vmem>>, vector<32x128xf32>,
    %c1_i32_63 = arith.constant 1 : i32
    %102 = tpu.dynamic_rotate %86 by %c1_i32_63 dim 1 : vector<32x128xf32>, i32 -> vector<32x128xf32>
    %c3_64 = arith.constant 3 : index
    %c0_65 = arith.constant 0 : index
    %103 = vector.load %arg11[%c3_64, %c0_65] : memref<9x128xf32, #tpu.memory_space<vmem>>, vector<1x128xf32>
    %104 = vector.broadcast %103 : vector<1x128xf32> to vector<32x128xf32>
    %105 = arith.mulf %102, %104 : vector<32x128xf32>
    %c96 = arith.constant 96 : index
    %c0_66 = arith.constant 0 : index
    %106 = vector.load %arg14[%c96, %c0_66] : memref<288x128xf32, #tpu.memory_space<vmem>>, vector<32x128xf32>
    tpu.vector_store %arg14[%c96, %c0_66], %105 {strides = array<i32>} : memref<288x128xf32, #tpu.memory_space<vmem>>, vector<32x128xf32>,
    %c128 = arith.constant 128 : index
    %c0_67 = arith.constant 0 : index
    %107 = vector.load %arg14[%c128, %c0_67] : memref<288x128xf32, #tpu.memory_space<vmem>>, vector<32x128xf32>
    tpu.vector_store %arg14[%c128, %c0_67], %86 {strides = array<i32>} : memref<288x128xf32, #tpu.memory_space<vmem>>, vector<32x128xf32>,
    %c127_i32 = arith.constant 127 : i32
    %108 = tpu.dynamic_rotate %86 by %c127_i32 dim 1 : vector<32x128xf32>, i32 -> vector<32x128xf32>
    %c5_68 = arith.constant 5 : index
    %c0_69 = arith.constant 0 : index
    %109 = vector.load %arg11[%c5_68, %c0_69] : memref<9x128xf32, #tpu.memory_space<vmem>>, vector<1x128xf32>
    %110 = vector.broadcast %109 : vector<1x128xf32> to vector<32x128xf32>
    %111 = arith.mulf %108, %110 : vector<32x128xf32>
    %c160 = arith.constant 160 : index
    %c0_70 = arith.constant 0 : index
    %112 = vector.load %arg14[%c160, %c0_70] : memref<288x128xf32, #tpu.memory_space<vmem>>, vector<32x128xf32>
    tpu.vector_store %arg14[%c160, %c0_70], %111 {strides = array<i32>} : memref<288x128xf32, #tpu.memory_space<vmem>>, vector<32x128xf32>,
    %c121_i32 = arith.constant 121 : i32
    %113 = tpu.dynamic_rotate %86 by %c121_i32 dim 1 : vector<32x128xf32>, i32 -> vector<32x128xf32>
    %c6_71 = arith.constant 6 : index
    %c0_72 = arith.constant 0 : index
    %114 = vector.load %arg11[%c6_71, %c0_72] : memref<9x128xf32, #tpu.memory_space<vmem>>, vector<1x128xf32>
    %115 = vector.broadcast %114 : vector<1x128xf32> to vector<32x128xf32>
    %116 = arith.mulf %113, %115 : vector<32x128xf32>
    %c192 = arith.constant 192 : index
    %c0_73 = arith.constant 0 : index
    %117 = vector.load %arg14[%c192, %c0_73] : memref<288x128xf32, #tpu.memory_space<vmem>>, vector<32x128xf32>
    tpu.vector_store %arg14[%c192, %c0_73], %116 {strides = array<i32>} : memref<288x128xf32, #tpu.memory_space<vmem>>, vector<32x128xf32>,
    %c120_i32 = arith.constant 120 : i32
    %118 = tpu.dynamic_rotate %86 by %c120_i32 dim 1 : vector<32x128xf32>, i32 -> vector<32x128xf32>
    %c7_74 = arith.constant 7 : index
    %c0_75 = arith.constant 0 : index
    %119 = vector.load %arg11[%c7_74, %c0_75] : memref<9x128xf32, #tpu.memory_space<vmem>>, vector<1x128xf32>
    %120 = vector.broadcast %119 : vector<1x128xf32> to vector<32x128xf32>
    %121 = arith.mulf %118, %120 : vector<32x128xf32>
    %c224 = arith.constant 224 : index
    %c0_76 = arith.constant 0 : index
    %122 = vector.load %arg14[%c224, %c0_76] : memref<288x128xf32, #tpu.memory_space<vmem>>, vector<32x128xf32>
    tpu.vector_store %arg14[%c224, %c0_76], %121 {strides = array<i32>} : memref<288x128xf32, #tpu.memory_space<vmem>>, vector<32x128xf32>,
    %c119_i32 = arith.constant 119 : i32
    %123 = tpu.dynamic_rotate %86 by %c119_i32 dim 1 : vector<32x128xf32>, i32 -> vector<32x128xf32>
    %c8_77 = arith.constant 8 : index
    %c0_78 = arith.constant 0 : index
    %124 = vector.load %arg11[%c8_77, %c0_78] : memref<9x128xf32, #tpu.memory_space<vmem>>, vector<1x128xf32>
    %125 = vector.broadcast %124 : vector<1x128xf32> to vector<32x128xf32>
    %126 = arith.mulf %123, %125 : vector<32x128xf32>
    %c256 = arith.constant 256 : index
    %c0_79 = arith.constant 0 : index
    %127 = vector.load %arg14[%c256, %c0_79] : memref<288x128xf32, #tpu.memory_space<vmem>>, vector<32x128xf32>
    tpu.vector_store %arg14[%c256, %c0_79], %126 {strides = array<i32>} : memref<288x128xf32, #tpu.memory_space<vmem>>, vector<32x128xf32>,
    %c0_80 = arith.constant 0 : index
    %c0_81 = arith.constant 0 : index
    %128 = vector.load %arg5[%c0_80, %c0_81] : memref<16x288xf32, #tpu.memory_space<vmem>>, vector<16x288xf32>
    %c0_82 = arith.constant 0 : index
    %c0_83 = arith.constant 0 : index
    %129 = vector.load %arg14[%c0_82, %c0_83] : memref<288x128xf32, #tpu.memory_space<vmem>>, vector<288x128xf32>
    %cst_84 = arith.constant dense<0.000000e+00> : vector<16x128xf32>
    %130 = tpu.matmul %128, %129, %cst_84 {dimension_numbers = #tpu.dot_dimension_numbers<[1], [0], [0], [1], [0, 0, 1, 1], [], []>} : vector<16x288xf32>, vector<288x128xf32>, vector<16x128xf32> -> vector<16x128xf32>
    %c0_85 = arith.constant 0 : index
    %c0_86 = arith.constant 0 : index
    %131 = vector.load %arg6[%c0_85, %c0_86] : memref<16x1xf32, #tpu.memory_space<vmem>>, vector<16x1xf32>
    %132 = vector.broadcast %131 : vector<16x1xf32> to vector<16x128xf32>
    %133 = arith.addf %130, %132 : vector<16x128xf32>
    %cst_87 = arith.constant 0.000000e+00 : f32
    %134 = vector.broadcast %cst_87 : f32 to vector<16x128xf32>
    %135 = arith.cmpf oge, %133, %134 : vector<16x128xf32>
    %cst_88 = arith.constant 2.000000e-01 : f32
    %136 = vector.broadcast %cst_88 : f32 to vector<16x128xf32>
    %137 = arith.mulf %136, %133 : vector<16x128xf32>
    %138 = arith.select %135, %133, %137 : vector<16x128xi1>, vector<16x128xf32>
    %cst_89 = arith.constant 1.000000e+00 : f32
    %139 = vector.broadcast %cst_89 : f32 to vector<16x128xf32>
    %140 = arith.mulf %138, %139 : vector<16x128xf32>
    %cst_90 = arith.constant -181.019333 : f32
    %cst_91 = arith.constant 181.019333 : f32
    %141 = vector.broadcast %cst_90 : f32 to vector<16x128xf32>
    %142 = arith.maximumf %141, %140 : vector<16x128xf32>
    %143 = vector.broadcast %cst_91 : f32 to vector<16x128xf32>
    %144 = arith.minimumf %143, %142 : vector<16x128xf32>
    %145 = arith.addf %20, %144 : vector<16x128xf32>
    %c0_92 = arith.constant 0 : index
    %c0_93 = arith.constant 0 : index
    %146 = vector.load %arg12[%c0_92, %c0_93] : memref<16x128xf32, #tpu.memory_space<vmem>>, vector<16x128xf32>
    tpu.vector_store %arg12[%c0_92, %c0_93], %145 {strides = array<i32>} : memref<16x128xf32, #tpu.memory_space<vmem>>, vector<16x128xf32>,
    return
  }
}

</mosaic_0001>

<bundles_post_ra>
// kernel: disc_block_forward.1
= control target key start
LH: loop header
LB: loop body
LE: loop exit
PB: predicated region body
PF: predicated region fallthrough
CT: control target
= control target key end

     0   :  { %17 = vsyncpa [#allocation5], 0  ;;  %s3734_s0 = inlined_call_operand.vmem [shape: f32[3,512], index: 0, kind: input, shape index: {}]   ;;  %s3735_s1 = inlined_call_operand.vmem [shape: f32[8,3], index: 1, kind: input, shape index: {}]   ;;  %s3736_s2 = inlined_call_operand.vmem [shape: f32[8,1], index: 2, kind: input, shape index: {}]   ;;  %s3737_s3 = inlined_call_operand.vmem [shape: f32[8,72], index: 3, kind: input, shape index: {}]   ;;  %s3738_s4 = inlined_call_operand.vmem [shape: f32[8,1], index: 4, kind: input, shape index: {}]   ;;  %s3739_s5 = inlined_call_operand.vmem [shape: f32[16,288], index: 5, kind: input, shape index: {}]   ;;  %s3740_s6 = inlined_call_operand.vmem [shape: f32[16,1], index: 6, kind: input, shape index: {}]   ;;  %s3741_s7 = inlined_call_operand.vmem [shape: f32[16,8], index: 7, kind: input, shape index: {}]   ;;  %s3742_s8 = inlined_call_operand.hbm [shape: bf16[512,512], index: 8, kind: input, shape index: {}]   ;;  %s3743_s9 = inlined_call_operand.hbm [shape: f32[512,128], index: 9, kind: input, shape index: {}]   ;;  %s3744_s10 = inlined_call_operand.vmem [shape: f32[9,512], index: 10, kind: input, shape index: {}]   ;;  %s3745_s11 = inlined_call_operand.vmem [shape: f32[9,128], index: 11, kind: input, shape index: {}]   ;;  %s3746_s12 = inlined_call_operand.vmem [shape: f32[16,128], index: 12, kind: output, shape index: {}]  }
   0x1   :  { %18 = vsyncpa [#allocation7], 0  ;;  %s3146_s21 = smov [#allocation4]   ;;  %s3098_s25 = scalar_lea.hbm %s3742_s8, 16384 }
   0x2   :  { %s40_s22 = sshll.u32 %s3146_s21, 4  ;;  %p3099_p0 = scmp.ne.s32.totalorder %s3742_s8, %s3098_s25  ;;  %s41_s22 = int_to_ptr.vmem [resolvable:$true] %s40_s22 }
   0x3   :  { %p3102_p1 = scmp.lt.u32.totalorder %s3098_s25, %s3742_s8 }
   0x5   :  { %p3104_p2 = pnand %p3102_p1, %p3099_p0 }
   0x7   :  { %3107 = shalt.err (!%p3104_p2)
}
   0x8   :  { %s3108_s30 = scalar_lea.vmem %s41_s22, 16384  ;;  %p3113_p4 = scmp.lt.s32.totalorder %s41_s22, %s41_s22 }
   0x9   :  { %p3109_p3 = scmp.ne.s32.totalorder %s41_s22, %s3108_s30  ;;  %p3114_p5 = scmp.lt.s32.totalorder %s3108_s30, %s3108_s30 }
   0xb   :  { %p3115_p6 = por %p3114_p5, %p3113_p4 }
   0xd   :  { %p3116_p7 = pnand %p3115_p6, %p3109_p3 }
   0xf   :  { %3119 = shalt.err (!%p3116_p7)
}
  0x10   :  { %s3147_s13 = smov 256   ;;  %s3148_s14 = smov 16  }
  0x11   :  { %46 = dma.hbm_to_vmem [thread:$0]  %s3742_s8, 16384, %s41_s22, [#allocation5], %s3147_s13, %s3147_s13, %s3148_s14  }
  0x12   :  { %s3149_s17 = smov [#allocation6]   ;;  %s3120_s21 = scalar_lea.hbm %s3743_s9, 8192 }
  0x13   :  { %s52_s18 = sshll.u32 %s3149_s17, 4  ;;  %p3121_p8 = scmp.ne.s32.totalorder %s3743_s9, %s3120_s21  ;;  %s53_s18 = int_to_ptr.vmem [resolvable:$true] %s52_s18 }
  0x14   :  { %p3124_p9 = scmp.lt.u32.totalorder %s3120_s21, %s3743_s9 }
  0x16   :  { %p3126_p10 = pnand %p3124_p9, %p3121_p8 }
  0x18   :  { %3129 = shalt.err (!%p3126_p10)
}
  0x19   :  { %s3130_s27 = scalar_lea.vmem %s53_s18, 8192  ;;  %p3135_p12 = scmp.lt.s32.totalorder %s53_s18, %s53_s18 }
  0x1a   :  { %p3131_p11 = scmp.ne.s32.totalorder %s53_s18, %s3130_s27  ;;  %p3136_p13 = scmp.lt.s32.totalorder %s3130_s27, %s3130_s27 }
  0x1c   :  { %p3137_p0 = por %p3136_p13, %p3135_p12 }
  0x1e   :  { %p3138_p1 = pnand %p3137_p0, %p3131_p11 }
  0x20   :  { %3141 = shalt.err (!%p3138_p1)
}
  0x21   :  { %s3150_s8 = smov 128   ;;  %s3151_s22 = smov 8  }
  0x22   :  { %58 = dma.hbm_to_vmem [thread:$0]  %s3743_s9, 8192, %s53_s18, [#allocation7], %s3150_s8, %s3150_s8, %s3151_s22  }
  0x23   :  { %3142 = dma.done.wait [#allocation5], 16384  }
  0x24   :  { %3143 = vsyncadd [#allocation5], 4294950912 }
  0x25   :  { %3144 = dma.done.wait [#allocation7], 8192  }
  0x26   :  { %3145 = vsyncadd [#allocation7], 4294959104  ;;  %v3152_v0 = vmov 0.0   ;;  %v3153_v1 = vmov 0   ;;  %v70_v2 = vld [vmem:[%s3734_s0] sm:$0x77] }
  0x27   :  { %159 = vmatprep.mubr.f32.mxu0 %v3152_v0  ;;  %230 = vmatprep.mubr.f32.mxu1 %v3152_v0  ;;  %vm86_vm0 = vcmask 1042432   ;;  %v71_v3 = vld [vmem:[%s3734_s0 + $0x8] sm:$0x77]  ;;  %v69_v4 = vld [vmem:[%s3735_s1] sm:$0xff]  ;;  %v80_v5 = vcombine.high %v70_v2, %v70_v2  ;;  %vm82_vm1 = vcmask 23552   ;;  %v279_v20 = vld [vmem:[#allocation6 + $0x90] sm:$0xff] }
  0x28   :  { %2902 = vset.pattern.permute.xlu0 %v3153_v1  ;;  %2903 = vset.pattern.permute.xlu1 %v3153_v1  ;;  %v81_v6 = vcombine.high %v71_v3, %v71_v3  ;;  %v72_v7 = vld [vmem:[%s3736_s2] sm:$0xff]  ;;  %v278_v9 = vld [vmem:[#allocation6 + $0x88] sm:$0xff]  ;;  %v280_v21 = vld [vmem:[#allocation6 + $0x98] sm:$0xff]  ;;  %s3154_s0 = smov 17   ;;  %s3155_s1 = smov 15   ;;  %vm867_vm14 = vcmask 588800  }
  0x29   :  { %v277_v8 = vld [vmem:[#allocation6 + $0x80] sm:$0xff]  ;;  %75 = vperm.xlu0 %2902, %v72_v7   ;;  %v310_v12 = vld [vmem:[#allocation6 + $0x188] sm:$0xff]  ;;  %2188 = vmatprep.subr.msk.mxu0 %vm86_vm0, %v80_v5  ;;  %v311_v22 = vld [vmem:[#allocation6 + $0x190] sm:$0xff]  ;;  %v2362_v23 = vpack.c.bf16 %v280_v21, %v279_v20  ;;  %s3156_s2 = smov 127   ;;  %s3157_s20 = smov 1  }
  0x2a   :  { %v2358_v10 = vpack.c.bf16 %v278_v9, %v277_v8  ;;  %v309_v11 = vld [vmem:[#allocation6 + $0x180] sm:$0xff]  ;;  %2191 = vmatprep.subr.msk.mxu1 %vm86_vm0, %v81_v6  ;;  %v262_v15 = vld [vmem:[#allocation6 + $0x8] sm:$0xff]  ;;  %2189 = vmatpush1.msk.msra.mxu0 %vm86_vm0, %v70_v2  ;;  %v312_v24 = vld [vmem:[#allocation6 + $0x198] sm:$0xff]  ;;  %s3158_s21 = smov 113   ;;  %s3159_s23 = smov 112  }
  0x2b   :  { %v261_v13 = vld [vmem:[#allocation6] sm:$0xff]  ;;  %v2390_v14 = vpack.c.bf16 %v310_v12, %v309_v11  ;;  %v294_v17 = vld [vmem:[#allocation6 + $0x108] sm:$0xff]  ;;  %2192 = vmatpush1.msk.msra.mxu1 %vm86_vm0, %v71_v3  ;;  %2190 = vmatmul.mubr.msk.f32.vlgmr.msra.gmra.mrb[0].mxu0 %vm82_vm1, %v69_v4  ;;  %v263_v25 = vld [vmem:[#allocation6 + $0x10] sm:$0xff]  ;;  %v2394_v27 = vpack.c.bf16 %v312_v24, %v311_v22  ;;  %s3160_s24 = smov 111   ;;  %s3165_s26 = smov 119  }
  0x2c   :  { %v293_v16 = vld [vmem:[#allocation6 + $0x100] sm:$0xff]  ;;  %v2360_v18 = vpack.c.bf16 %v262_v15, %v261_v13  ;;  %2193 = vmatmul.mubr.msk.f32.vlgmr.msra.gmra.mrb[0].mxu1 %vm82_vm1, %v69_v4  ;;  %v264_v26 = vld [vmem:[#allocation6 + $0x18] sm:$0xff]  ;;  %2359 = vmatprep.subr.bf16.mxu0 %v2358_v10  ;;  %v295_v28 = vld [vmem:[#allocation6 + $0x110] sm:$0xff] }
  0x2d   :  { %v2392_v19 = vpack.c.bf16 %v294_v17, %v293_v16  ;;  %2391 = vmatprep.subr.bf16.mxu1 %v2390_v14  ;;  %v296_v29 = vld [vmem:[#allocation6 + $0x118] sm:$0xff]  ;;  %v281_v30 = vld [vmem:[#allocation6 + $0xa0] sm:$0xff]  ;;  %v2364_v31 = vpack.c.bf16 %v264_v26, %v263_v25  ;;  %v282_v33 = vld [vmem:[#allocation6 + $0xa8] sm:$0xff] }
  0x2e   :  { %2361 = vmatpush3.bf16.msra.mxu0 %v2360_v18  ;;  %v2396_v32 = vpack.c.bf16 %v296_v29, %v295_v28  ;;  %v313_v34 = vld [vmem:[#allocation6 + $0x1a0] sm:$0xff]  ;;  %v314_v35 = vld [vmem:[#allocation6 + $0x1a8] sm:$0xff]  ;;  %v2366_v36 = vpack.c.bf16 %v282_v33, %v281_v30  ;;  %v283_v42 = vld [vmem:[#allocation6 + $0xb0] sm:$0xff] }
  0x2f   :  { %2393 = vmatpush3.bf16.msra.mxu1 %v2392_v19  ;;  %2363 = vmatprep.subr.bf16.mxu0 %v2362_v23  ;;  %v2398_v37 = vpack.c.bf16 %v314_v35, %v313_v34  ;;  %v265_v38 = vld [vmem:[#allocation6 + $0x20] sm:$0xff]  ;;  %v266_v39 = vld [vmem:[#allocation6 + $0x28] sm:$0xff]  ;;  %v284_v43 = vld [vmem:[#allocation6 + $0xb8] sm:$0xff] }
  0x30   :  { %2395 = vmatprep.subr.bf16.mxu1 %v2394_v27  ;;  %v297_v40 = vld [vmem:[#allocation6 + $0x120] sm:$0xff]  ;;  %v298_v41 = vld [vmem:[#allocation6 + $0x128] sm:$0xff]  ;;  %v315_v44 = vld [vmem:[#allocation6 + $0x1b0] sm:$0xff]  ;;  %v2368_v46 = vpack.c.bf16 %v266_v39, %v265_v38  ;;  %v2370_v50 = vpack.c.bf16 %v284_v43, %v283_v42 }
  0x31   :  { %v316_v45 = vld [vmem:[#allocation6 + $0x1b8] sm:$0xff]  ;;  %v2400_v47 = vpack.c.bf16 %v298_v41, %v297_v40  ;;  %v267_v48 = vld [vmem:[#allocation6 + $0x30] sm:$0xff]  ;;  %v285_v54 = vld [vmem:[#allocation6 + $0xc0] sm:$0xff] }
  0x32   :  { %2365 = vmatpush3.bf16.msra.mxu0 %v2364_v31  ;;  %v268_v49 = vld [vmem:[#allocation6 + $0x38] sm:$0xff]  ;;  %v2402_v51 = vpack.c.bf16 %v316_v45, %v315_v44  ;;  %v299_v52 = vld [vmem:[#allocation6 + $0x130] sm:$0xff]  ;;  %v286_v55 = vld [vmem:[#allocation6 + $0xc8] sm:$0xff] }
  0x33   :  { %2397 = vmatpush3.bf16.msra.mxu1 %v2396_v32  ;;  %2367 = vmatprep.subr.bf16.mxu0 %v2366_v36  ;;  %v300_v53 = vld [vmem:[#allocation6 + $0x138] sm:$0xff]  ;;  %v317_v56 = vld [vmem:[#allocation6 + $0x1c0] sm:$0xff]  ;;  %v318_v57 = vld [vmem:[#allocation6 + $0x1c8] sm:$0xff]  ;;  %v2372_v62 = vpack.c.bf16 %v268_v49, %v267_v48  ;;  %v2374_v1 = vpack.c.bf16 %v286_v55, %v285_v54 }
  0x34   :  { %2399 = vmatprep.subr.bf16.mxu1 %v2398_v37  ;;  %v269_v58 = vld [vmem:[#allocation6 + $0x40] sm:$0xff]  ;;  %v270_v59 = vld [vmem:[#allocation6 + $0x48] sm:$0xff]  ;;  %v2404_v63 = vpack.c.bf16 %v300_v53, %v299_v52  ;;  %v2406_v2 = vpack.c.bf16 %v318_v57, %v317_v56  ;;  %v287_v5 = vld [vmem:[#allocation6 + $0xd0] sm:$0xff] }
  0x35   :  { %v301_v60 = vld [vmem:[#allocation6 + $0x140] sm:$0xff]  ;;  %v302_v61 = vld [vmem:[#allocation6 + $0x148] sm:$0xff]  ;;  %v2376_v3 = vpack.c.bf16 %v270_v59, %v269_v58  ;;  %v288_v6 = vld [vmem:[#allocation6 + $0xd8] sm:$0xff] }
  0x36   :  { %2369 = vmatpush3.bf16.msra.mxu0 %v2368_v46  ;;  %v2408_v4 = vpack.c.bf16 %v302_v61, %v301_v60  ;;  %v319_v7 = vld [vmem:[#allocation6 + $0x1d0] sm:$0xff]  ;;  %v2378_v8 = vpack.c.bf16 %v288_v6, %v287_v5  ;;  %v320_v9 = vld [vmem:[#allocation6 + $0x1d8] sm:$0xff]  ;;  %v289_v17 = vld [vmem:[#allocation6 + $0xe0] sm:$0xff] }
  0x37   :  { %2401 = vmatpush3.bf16.msra.mxu1 %v2400_v47  ;;  %2371 = vmatprep.subr.bf16.mxu0 %v2370_v50  ;;  %v271_v10 = vld [vmem:[#allocation6 + $0x50] sm:$0xff]  ;;  %v272_v11 = vld [vmem:[#allocation6 + $0x58] sm:$0xff]  ;;  %v2410_v12 = vpack.c.bf16 %v320_v9, %v319_v7  ;;  %v290_v18 = vld [vmem:[#allocation6 + $0xe8] sm:$0xff] }
  0x38   :  { %2403 = vmatprep.subr.bf16.mxu1 %v2402_v51  ;;  %v2380_v13 = vpack.c.bf16 %v272_v11, %v271_v10  ;;  %v303_v14 = vld [vmem:[#allocation6 + $0x150] sm:$0xff]  ;;  %v304_v15 = vld [vmem:[#allocation6 + $0x158] sm:$0xff]  ;;  %v321_v19 = vld [vmem:[#allocation6 + $0x1e0] sm:$0xff]  ;;  %v2382_v20 = vpack.c.bf16 %v290_v18, %v289_v17 }
  0x39   :  { %v2412_v16 = vpack.c.bf16 %v304_v15, %v303_v14  ;;  %v322_v21 = vld [vmem:[#allocation6 + $0x1e8] sm:$0xff]  ;;  %v273_v22 = vld [vmem:[#allocation6 + $0x60] sm:$0xff]  ;;  %v291_v29 = vld [vmem:[#allocation6 + $0xf0] sm:$0xff] }
  0x3a   :  { %2373 = vmatpush3.bf16.msra.mxu0 %v2372_v62  ;;  %v274_v23 = vld [vmem:[#allocation6 + $0x68] sm:$0xff]  ;;  %v2414_v24 = vpack.c.bf16 %v322_v21, %v321_v19  ;;  %v305_v26 = vld [vmem:[#allocation6 + $0x160] sm:$0xff]  ;;  %v292_v30 = vld [vmem:[#allocation6 + $0xf8] sm:$0xff] }
  0x3b   :  { %2405 = vmatpush3.bf16.msra.mxu1 %v2404_v63  ;;  %2375 = vmatprep.subr.bf16.mxu0 %v2374_v1  ;;  %v2384_v25 = vpack.c.bf16 %v274_v23, %v273_v22  ;;  %v306_v27 = vld [vmem:[#allocation6 + $0x168] sm:$0xff]  ;;  %v323_v31 = vld [vmem:[#allocation6 + $0x1f0] sm:$0xff]  ;;  %v2386_v32 = vpack.c.bf16 %v292_v30, %v291_v29  ;;  %v324_v33 = vld [vmem:[#allocation6 + $0x1f8] sm:$0xff] }
  0x3c   :  { %2407 = vmatprep.subr.bf16.mxu1 %v2406_v2  ;;  %v2416_v28 = vpack.c.bf16 %v306_v27, %v305_v26  ;;  %v275_v34 = vld [vmem:[#allocation6 + $0x70] sm:$0xff]  ;;  %v276_v35 = vld [vmem:[#allocation6 + $0x78] sm:$0xff]  ;;  %v2418_v36 = vpack.c.bf16 %v324_v33, %v323_v31 }
  0x3d   :  { %v2388_v37 = vpack.c.bf16 %v276_v35, %v275_v34  ;;  %v307_v38 = vld [vmem:[#allocation6 + $0x170] sm:$0xff]  ;;  %v308_v39 = vld [vmem:[#allocation6 + $0x178] sm:$0xff] }
  0x3e   :  { %2377 = vmatpush3.bf16.msra.mxu0 %v2376_v3  ;;  %v2420_v40 = vpack.c.bf16 %v308_v39, %v307_v38  ;;  %v861_v3 = vld [vmem:[%s3738_s4] sm:$0xff] }
  0x3f   :  { %2409 = vmatpush3.bf16.msra.mxu1 %v2408_v4  ;;  %2379 = vmatprep.subr.bf16.mxu0 %v2378_v8  ;;  %v2906_v4 = vld [vmem:[#allocation4 + $0x4] ss:$16 sps:$4 sm:$0xff]   ;;  %v2908_v5 = vld [vmem:[#allocation4] ss:$16 sps:$4 sm:$0xff]  }
  0x40   :  { %2411 = vmatprep.subr.bf16.mxu1 %v2410_v12  ;;  %v2912_v6 = vld [vmem:[#allocation4 + $0x24] ss:$16 sps:$4 sm:$0xff]   ;;  %v2914_v7 = vld [vmem:[#allocation4 + $0x20] ss:$16 sps:$4 sm:$0xff]  }
  0x41   :  { %v2918_v8 = vld [vmem:[#allocation4 + $0x44] ss:$16 sps:$4 sm:$0xff]   ;;  %v2920_v9 = vld [vmem:[#allocation4 + $0x40] ss:$16 sps:$4 sm:$0xff]  }
  0x42   :  { %2381 = vmatpush3.bf16.msra.mxu0 %v2380_v13  ;;  %v2924_v10 = vld [vmem:[#allocation4 + $0x64] ss:$16 sps:$4 sm:$0xff]   ;;  %v2926_v11 = vld [vmem:[#allocation4 + $0x60] ss:$16 sps:$4 sm:$0xff]  }
  0x43   :  { %2413 = vmatpush3.bf16.msra.mxu1 %v2412_v16  ;;  %2383 = vmatprep.subr.bf16.mxu0 %v2382_v20  ;;  %v2930_v12 = vld [vmem:[#allocation4 + $0x84] ss:$16 sps:$4 sm:$0xff]   ;;  %v2932_v13 = vld [vmem:[#allocation4 + $0x80] ss:$16 sps:$4 sm:$0xff]  }
  0x44   :  { %2415 = vmatprep.subr.bf16.mxu1 %v2414_v24  ;;  %v2936_v14 = vld [vmem:[#allocation4 + $0xa4] ss:$16 sps:$4 sm:$0xff]   ;;  %v2938_v15 = vld [vmem:[#allocation4 + $0xa0] ss:$16 sps:$4 sm:$0xff]  }
  0x45   :  { %v2942_v16 = vld [vmem:[#allocation4 + $0xc4] ss:$16 sps:$4 sm:$0xff]   ;;  %v2944_v17 = vld [vmem:[#allocation4 + $0xc0] ss:$16 sps:$4 sm:$0xff]  }
  0x46   :  { %2385 = vmatpush3.bf16.msra.mxu0 %v2384_v25  ;;  %v2948_v18 = vld [vmem:[#allocation4 + $0xe4] ss:$16 sps:$4 sm:$0xff]   ;;  %v2950_v21 = vld [vmem:[#allocation4 + $0xe0] ss:$16 sps:$4 sm:$0xff]   ;;  %v475_v25 = vlaneseq }
  0x47   :  { %2417 = vmatpush3.bf16.msra.mxu1 %v2416_v28  ;;  %2387 = vmatprep.subr.bf16.mxu0 %v2386_v32  ;;  %v2954_v22 = vld [vmem:[#allocation4 + $0x104] ss:$16 sps:$4 sm:$0xff]   ;;  %v2956_v26 = vld [vmem:[#allocation4 + $0x100] ss:$16 sps:$4 sm:$0xff]  }
  0x48   :  { %2419 = vmatprep.subr.bf16.mxu1 %v2418_v36  ;;  %v2960_v27 = vld [vmem:[#allocation4 + $0x124] ss:$16 sps:$4 sm:$0xff]   ;;  %v3355_v30 = vshrl.u32 %v475_v25, 7  ;;  %v2962_v31 = vld [vmem:[#allocation4 + $0x120] ss:$16 sps:$4 sm:$0xff]   ;;  %v3357_v33 = vand.u32 127, %v475_v25 }
  0x49   :  { %v2966_v32 = vld [vmem:[#allocation4 + $0x144] ss:$16 sps:$4 sm:$0xff]   ;;  %v2968_v38 = vld [vmem:[#allocation4 + $0x140] ss:$16 sps:$4 sm:$0xff]  }
  0x4a   :  { %2389 = vmatpush3.bf16.msra.mxu0 %v2388_v37  ;;  %v3364_v36 = vsub.s32 1, %v3355_v30  ;;  %v3369_v37 = vld [vmem:[%s3744_s10 + $0x1] ss:$8 sm:$0xf]  ;;  %vm520_vm6 = vcmp.lt.s32.totalorder %v3357_v33, 16  ;;  %vm477_vm7 = vcmp.lt.s32.totalorder %v3357_v33, 17 }
  0x4b   :  { %2421 = vmatpush3.bf16.msra.mxu1 %v2420_v40  ;;  %2455 = vmatprep.subr.bf16.mxu0 %v2906_v4  ;;  %v3374_v39 = vld [vmem:[%s3744_s10] ss:$8 sm:$0xf]  ;;  %v2972_v40 = vld [vmem:[#allocation4 + $0x164] ss:$16 sps:$4 sm:$0xff]   ;;  %vm608_vm8 = vcmp.lt.s32.totalorder %v3357_v33, 1 }
  0x4c   :  { %vm564_vm9 = vcmp.lt.s32.totalorder %v3357_v33, 15  ;;  %v2984_v4 = vld [vmem:[#allocation4 + $0x1a4] ss:$16 sps:$4 sm:$0xff]   ;;  %vm656_vm10 = vcmp.lt.s32.totalorder %v3357_v33, 127  ;;  %vm700_vm11 = vcmp.lt.s32.totalorder %v3357_v33, 113  ;;  %vm744_vm12 = vcmp.lt.s32.totalorder %v3357_v33, 112 }
  0x4d   :  { %vm788_vm13 = vcmp.lt.s32.totalorder %v3357_v33, 111  ;;  %v2923_v33 = vld [vmem:[#allocation4 + $0x48] ss:$16 sps:$4 sm:$0xff]  }
  0xa8   :  { %v76_v41 = vpop.permute.xlu0 %75 }
  0xfe   :  { %v161_v42 = vpop.f32.mrb[0].mxu0 }
  0xff   :  { %v232_v43 = vpop.f32.mrb[0].mxu1  ;;  %v162_v44 = vadd.f32 %v161_v42, %v76_v41  ;;  %v163_v46 = vpop.f32.mrb[1].mxu0 }
 0x100   :  { %v233_v45 = vadd.f32 %v232_v43, %v76_v41  ;;  %v234_v47 = vpop.f32.mrb[1].mxu1  ;;  %v164_v48 = vadd.f32 %v163_v46, %v76_v41  ;;  %v3382_v43 = vsub.s32 0, %v3355_v30  ;;  %v3392_v46 = vld [vmem:[%s3744_s10 + $0x3] ss:$8 sm:$0xf] }
 0x101   :  { %v235_v49 = vadd.f32 %v234_v47, %v76_v41  ;;  %vm237_vm2 = vcmp.ge.f32.partialorder %v162_v44, 0.0  ;;  %v241_v50 = vmul.f32 0.2, %v162_v44  ;;  %v2974_v47 = vld [vmem:[#allocation4 + $0x160] ss:$16 sps:$4 sm:$0xff]  }
 0x102   :  { %vm239_vm3 = vcmp.ge.f32.partialorder %v233_v45, 0.0  ;;  %v243_v51 = vmul.f32 0.2, %v233_v45  ;;  %vm238_vm4 = vcmp.ge.f32.partialorder %v164_v48, 0.0  ;;  %v242_v52 = vmul.f32 0.2, %v164_v48 }
 0x103   :  { %vm240_vm5 = vcmp.ge.f32.partialorder %v235_v49, 0.0  ;;  %v244_v53 = vmul.f32 0.2, %v235_v49  ;;  %v245_v54 = vsel %vm237_vm2, %v162_v44, %v241_v50  ;;  %v535_v44 = vrot.slane %v3369_v37, %v3364_v36  ;;  %v3401_v50 = vld [vmem:[%s3744_s10 + $0x2] ss:$8 sm:$0xf] }
 0x104   :  { %v247_v55 = vsel %vm239_vm3, %v233_v45, %v243_v51  ;;  %v249_v56 = vmul.f32 1.4142135, %v245_v54  ;;  %v246_v58 = vsel %vm238_vm4, %v164_v48, %v242_v52  ;;  %v491_v45 = vrot.slane %v3374_v39, %v3364_v36 }
 0x105   :  { %v251_v57 = vmul.f32 1.4142135, %v247_v55  ;;  %v248_v59 = vsel %vm240_vm5, %v235_v49, %v244_v53  ;;  %v250_v60 = vmul.f32 1.4142135, %v246_v58  ;;  %v2978_v49 = vld [vmem:[#allocation4 + $0x184] ss:$16 sps:$4 sm:$0xff]   ;;  %v531_v53 = vrot.slane %v3369_v37, %v3382_v43 }
 0x106   :  { %v252_v61 = vmul.f32 1.4142135, %v248_v59  ;;  %v3277_v62 = vclamps-f32 %v249_v56, 256.0  ;;  %v623_v55 = vrot.slane %v3392_v46, %v3364_v36  ;;  %v487_v59 = vrot.slane %v3374_v39, %v3382_v43 }
 0x107   :  { %v3279_v63 = vclamps-f32 %v250_v60, 256.0  ;;  %v3283_v2 = vclamps-f32 %v251_v57, 256.0  ;;  %v2980_v60 = vld [vmem:[#allocation4 + $0x180] ss:$16 sps:$4 sm:$0xff]   ;;  %vm2098_vm3 = vcmask 64512   ;;  %vm1931_vm4 = vcmask 261120  }
 0x108   :  { %v3281_v1 = vclamps-f32 %v252_v61, 256.0  ;;  %512 = vrot.lane.b32.xlu1 %v3277_v62, %s3148_s14  ;;  %467 = vrot.lane.b32.xlu0 %v3277_v62, %s3154_s0 }
 0x109   :  { %389 = vmatprep.mubr.f32.mxu0 %v3279_v63 }
 0x10a   :  { %459 = vmatprep.mubr.f32.mxu1 %v3281_v1  ;;  %390 = vmatmul.mubr.f32.vlgmr.msra.gmra.mrb[2].mxu0 %v3277_v62 }
 0x10b   :  { %460 = vmatmul.mubr.f32.vlgmr.msra.gmra.mrb[2].mxu1 %v3283_v2  ;;  %2457 = vmatpush1.bf16.msra.mxu0 %v2908_v5 }
 0x10c   :  { %935 = vmatprep.mubr.f32.mxu1 %v3152_v0  ;;  %556 = vrot.lane.b32.xlu1 %v3277_v62, %s3155_s1 }
 0x10d   :  { %652 = vrot.lane.b32.xlu0 %v3283_v2, %s3156_s2  ;;  %2459 = vmatprep.subr.bf16.mxu0 %v2912_v6 }
 0x10f   :  { %2461 = vmatpush1.bf16.msra.mxu0 %v2914_v7 }
 0x110   :  { %600 = vrot.lane.b32.xlu1 %v3277_v62, %s3157_s20  ;;  %2463 = vmatprep.subr.bf16.mxu0 %v2918_v8 }
 0x111   :  { %514 = vrot.lane.b32.xlu0 %v3279_v63, %s3148_s14 }
 0x113   :  { %2465 = vmatpush1.bf16.msra.mxu0 %v2920_v9 }
 0x114   :  { %648 = vrot.lane.b32.xlu1 %v3277_v62, %s3156_s2  ;;  %2467 = vmatprep.subr.bf16.mxu0 %v2924_v10 }
 0x115   :  { %518 = vrot.lane.b32.xlu0 %v3281_v1, %s3148_s14 }
 0x117   :  { %2469 = vmatpush1.bf16.msra.mxu0 %v2926_v11  ;;  %v619_v11 = vrot.slane %v3392_v46, %v3382_v43 }
 0x118   :  { %696 = vrot.lane.b32.xlu1 %v3283_v2, %s3158_s21  ;;  %2471 = vmatprep.subr.bf16.mxu0 %v2930_v12 }
 0x119   :  { %558 = vrot.lane.b32.xlu0 %v3279_v63, %s3155_s1 }
 0x11b   :  { %2473 = vmatpush1.bf16.msra.mxu0 %v2932_v13 }
 0x11c   :  { %469 = vrot.lane.b32.xlu1 %v3279_v63, %s3154_s0  ;;  %2475 = vmatprep.subr.bf16.mxu0 %v2936_v14  ;;  %v575_v14 = vrot.slane %v3401_v50, %v3382_v43 }
 0x11d   :  { %602 = vrot.lane.b32.xlu0 %v3279_v63, %s3157_s20 }
 0x11f   :  { %2477 = vmatpush1.bf16.msra.mxu0 %v2938_v15  ;;  %v3446_v15 = vld [vmem:[%s3744_s10 + $0x5] ss:$8 sm:$0xf] }
 0x120   :  { %473 = vrot.lane.b32.xlu1 %v3281_v1, %s3154_s0  ;;  %2479 = vmatprep.subr.bf16.mxu0 %v2942_v16  ;;  %v2986_v16 = vld [vmem:[#allocation4 + $0x1a0] ss:$16 sps:$4 sm:$0xff]  }
 0x121   :  { %606 = vrot.lane.b32.xlu0 %v3281_v1, %s3157_s20 }
 0x123   :  { %2481 = vmatpush1.bf16.msra.mxu0 %v2944_v17 }
 0x124   :  { %562 = vrot.lane.b32.xlu1 %v3281_v1, %s3155_s1  ;;  %2483 = vmatprep.subr.bf16.mxu0 %v2948_v18 }
 0x125   :  { %692 = vrot.lane.b32.xlu0 %v3277_v62, %s3158_s21 }
 0x127   :  { %2485 = vmatpush1.bf16.msra.mxu0 %v2950_v21 }
 0x128   :  { %650 = vrot.lane.b32.xlu1 %v3279_v63, %s3156_s2  ;;  %2487 = vmatprep.subr.bf16.mxu0 %v2954_v22 }
 0x129   :  { %694 = vrot.lane.b32.xlu0 %v3279_v63, %s3158_s21 }
 0x12b   :  { %2489 = vmatpush1.bf16.msra.mxu0 %v2956_v26  ;;  %v667_v26 = vrot.slane %v3446_v15, %v3382_v43 }
 0x12c   :  { %740 = vrot.lane.b32.xlu1 %v3283_v2, %s3159_s23  ;;  %2491 = vmatprep.subr.bf16.mxu0 %v2960_v27 }
 0x12d   :  { %738 = vrot.lane.b32.xlu0 %v3279_v63, %s3159_s23 }
 0x12f   :  { %2493 = vmatpush1.bf16.msra.mxu0 %v2962_v31 }
 0x130   :  { %736 = vrot.lane.b32.xlu1 %v3277_v62, %s3159_s23  ;;  %2495 = vmatprep.subr.bf16.mxu0 %v2966_v32  ;;  %v3468_v32 = vld [vmem:[%s3744_s10 + $0x6] ss:$8 sm:$0xf] }
 0x131   :  { %782 = vrot.lane.b32.xlu0 %v3279_v63, %s3160_s24 }
 0x133   :  { %2497 = vmatpush1.bf16.msra.mxu0 %v2968_v38 }
 0x134   :  { %784 = vrot.lane.b32.xlu1 %v3283_v2, %s3160_s24  ;;  %2499 = vmatprep.subr.bf16.mxu0 %v2972_v40 }
 0x135   :  { %780 = vrot.lane.b32.xlu0 %v3277_v62, %s3160_s24 }
 0x137   :  { %2501 = vmatpush1.bf16.msra.mxu0 %v2974_v47 }
 0x138   :  { %471 = vrot.lane.b32.xlu1 %v3283_v2, %s3154_s0  ;;  %2503 = vmatprep.subr.bf16.mxu0 %v2978_v49 }
 0x139   :  { %516 = vrot.lane.b32.xlu0 %v3283_v2, %s3148_s14 }
 0x13b   :  { %2505 = vmatpush1.bf16.msra.mxu0 %v2980_v60 }
 0x13c   :  { %560 = vrot.lane.b32.xlu1 %v3283_v2, %s3155_s1  ;;  %2507 = vmatprep.subr.bf16.mxu0 %v2984_v4 }
 0x13d   :  { %604 = vrot.lane.b32.xlu0 %v3283_v2, %s3157_s20 }
 0x13f   :  { %2509 = vmatpush1.bf16.msra.mxu0 %v2986_v16 }
 0x140   :  { %654 = vrot.lane.b32.xlu1 %v3281_v1, %s3156_s2 }
 0x141   :  { %698 = vrot.lane.b32.xlu0 %v3281_v1, %s3158_s21 }
 0x144   :  { %742 = vrot.lane.b32.xlu1 %v3281_v1, %s3159_s23  ;;  %s3162_s23 = smov 121  }
 0x145   :  { %786 = vrot.lane.b32.xlu0 %v3281_v1, %s3160_s24  ;;  %s3163_s24 = smov 7  }
 0x148   :  { %864 = vperm.xlu1 %2903, %v861_v3   ;;  %v579_v3 = vrot.slane %v3401_v50, %v3364_v36 }
 0x17a   :  { %v513_v19 = vpop.permute.xlu1 %512  ;;  %v3345_v20 = vpop.permute.xlu0 %467 }
 0x17e   :  { %v3347_v23 = vpop.permute.xlu1 %556 }
 0x17f   :  { %v3349_v24 = vpop.permute.xlu0 %652 }
 0x182   :  { %v3351_v28 = vpop.permute.xlu1 %600 }
 0x183   :  { %v3353_v29 = vpop.permute.xlu0 %514 }
 0x184   :  { %v523_v48 = vsel %vm520_vm6, %v513_v19, %v3353_v29 }
 0x185   :  { %v549_v56 = vmul.f32 %v535_v44, %v523_v48  ;;  %v715_v48 = vrot.slane %v3468_v32, %v3364_v36 }
 0x186   :  { %v3359_v34 = vpop.permute.xlu1 %648 }
 0x187   :  { %v3361_v35 = vpop.permute.xlu0 %518 }
 0x188   :  { %v524_v61 = vsel %vm520_vm6, %v3361_v35, %v513_v19 }
 0x189   :  { %v548_v12 = vmul.f32 %v531_v53, %v524_v61  ;;  %v711_v61 = vrot.slane %v3468_v32, %v3382_v43 }
 0x18a   :  { %v3377_v41 = vpop.permute.xlu1 %696 }
 0x18b   :  { %v3379_v42 = vpop.permute.xlu0 %558 }
 0x18c   :  { %v567_v5 = vsel %vm564_vm9, %v3347_v23, %v3379_v42 }
 0x18d   :  { %v593_v17 = vmul.f32 %v579_v3, %v567_v5 }
 0x18e   :  { %v3403_v51 = vpop.permute.xlu1 %469 }
 0x18f   :  { %v3405_v52 = vpop.permute.xlu0 %602  ;;  %v480_v54 = vsel %vm477_vm7, %v3345_v20, %v3403_v51 }
 0x190   :  { %v505_v57 = vmul.f32 %v491_v45, %v480_v54  ;;  %v611_v58 = vsel %vm608_vm8, %v3351_v28, %v3405_v52 }
 0x191   :  { %v637_v9 = vmul.f32 %v623_v55, %v611_v58 }
 0x192   :  { %v3431_v6 = vpop.permute.xlu1 %473  ;;  %v2422_v8 = vpack.c.bf16 %v549_v56, %v505_v57 }
 0x193   :  { %v3433_v7 = vpop.permute.xlu0 %606  ;;  %v481_v10 = vsel %vm477_vm7, %v3431_v6, %v3345_v20  ;;  %v2426_v25 = vpack.c.bf16 %v637_v9, %v593_v17  ;;  %v3521_v17 = vsub.s32 3, %v3355_v30 }
 0x194   :  { %v504_v13 = vmul.f32 %v487_v59, %v481_v10  ;;  %2423 = vmatprep.subr.bf16.mxu1 %v2422_v8  ;;  %v612_v18 = vsel %vm608_vm8, %v3433_v7, %v3351_v28  ;;  %v671_v28 = vrot.slane %v3446_v15, %v3364_v36 }
 0x195   :  { %v636_v27 = vmul.f32 %v619_v11, %v612_v18 }
 0x196   :  { %v2424_v19 = vpack.c.bf16 %v548_v12, %v504_v13  ;;  %v3452_v20 = vpop.permute.xlu1 %562  ;;  %v3516_v12 = vsub.s32 2, %v3355_v30 }
 0x197   :  { %v3454_v21 = vpop.permute.xlu0 %692  ;;  %v568_v22 = vsel %vm564_vm9, %v3452_v20, %v3347_v23  ;;  %v3473_v23 = vld [vmem:[%s3744_s10 + $0x7] ss:$8 sm:$0xf] }
 0x198   :  { %v592_v31 = vmul.f32 %v575_v14, %v568_v22  ;;  %2425 = vmatpush1.bf16.msra.mxu1 %v2424_v19  ;;  %v759_v54 = vrot.slane %v3473_v23, %v3364_v36  ;;  %v755_v5 = vrot.slane %v3473_v23, %v3382_v43  ;;  %v495_v30 = vrot.slane %v3374_v39, %v3516_v12 }
 0x199   :  { %2427 = vmatprep.subr.bf16.mxu1 %v2426_v25 }
 0x19a   :  { %v2428_v38 = vpack.c.bf16 %v636_v27, %v592_v31  ;;  %v651_v40 = vpop.permute.xlu1 %650  ;;  %v499_v31 = vrot.slane %v3374_v39, %v3521_v17  ;;  %v587_v39 = vrot.slane %v3401_v50, %v3521_v17 }
 0x19b   :  { %v695_v44 = vpop.permute.xlu0 %694  ;;  %v658_v45 = vsel %vm656_vm10, %v651_v40, %v3349_v24  ;;  %v659_v47 = vsel %vm656_vm10, %v3359_v34, %v651_v40 }
 0x19c   :  { %v684_v49 = vmul.f32 %v667_v26, %v659_v47  ;;  %v685_v53 = vmul.f32 %v671_v28, %v658_v45  ;;  %2429 = vmatpush1.bf16.msra.mxu1 %v2428_v38  ;;  %v702_v55 = vsel %vm700_vm11, %v695_v44, %v3377_v41  ;;  %v543_v28 = vrot.slane %v3369_v37, %v3521_v17  ;;  %v3548_v47 = vld [vmem:[%s3737_s3] sm:$0xff]  ;;  %s3161_s3 = smov 9  }
 0x19d   :  { %v729_v3 = vmul.f32 %v715_v48, %v702_v55  ;;  %v583_v38 = vrot.slane %v3401_v50, %v3516_v12  ;;  %v627_v48 = vrot.slane %v3392_v46, %v3516_v12 }
 0x19e   :  { %v2432_v56 = vpack.c.bf16 %v684_v49, %v3277_v62  ;;  %v3491_v57 = vpop.permute.xlu1 %740  ;;  %v2430_v59 = vpack.c.bf16 %v685_v53, %v3279_v63  ;;  %v703_v62 = vsel %vm700_vm11, %v3454_v21, %v695_v44  ;;  %v3507_v63 = vld [vmem:[%s3744_s10 + $0x20] ss:$8 sm:$0xf] }
 0x19f   :  { %v739_v58 = vpop.permute.xlu0 %738  ;;  %v728_v13 = vmul.f32 %v711_v61, %v703_v62  ;;  %v803_v16 = vrot.slane %v3507_v63, %v3364_v36  ;;  %v799_v22 = vrot.slane %v3507_v63, %v3382_v43  ;;  %v539_v43 = vrot.slane %v3369_v37, %v3516_v12 }
 0x1a0   :  { %v746_v60 = vsel %vm744_vm12, %v739_v58, %v3491_v57  ;;  %2431 = vmatprep.subr.bf16.mxu1 %v2430_v59  ;;  %v631_v37 = vrot.slane %v3392_v46, %v3521_v17  ;;  %v675_v61 = vrot.slane %v3446_v15, %v3516_v12 }
 0x1a1   :  { %v773_v4 = vmul.f32 %v759_v54, %v746_v60  ;;  %2433 = vmatpush1.bf16.msra.mxu1 %v2432_v56 }
 0x1a2   :  { %v3509_v8 = vpop.permute.xlu1 %736 }
 0x1a3   :  { %v783_v9 = vpop.permute.xlu0 %782  ;;  %v2434_v10 = vpack.c.bf16 %v773_v4, %v729_v3  ;;  %v747_v11 = vsel %vm744_vm12, %v3509_v8, %v739_v58 }
 0x1a4   :  { %v772_v14 = vmul.f32 %v755_v5, %v747_v11 }
 0x1a5   :  { %2435 = vmatprep.subr.bf16.mxu1 %v2434_v10 }
 0x1a6   :  { %v2436_v18 = vpack.c.bf16 %v772_v14, %v728_v13  ;;  %v3523_v19 = vpop.permute.xlu1 %784  ;;  %v723_v14 = vrot.slane %v3468_v32, %v3521_v17 }
 0x1a7   :  { %v3527_v25 = vpop.permute.xlu0 %780  ;;  %v790_v26 = vsel %vm788_vm13, %v783_v9, %v3523_v19 }
 0x1a8   :  { %v791_v27 = vsel %vm788_vm13, %v3527_v25, %v783_v9  ;;  %v817_v36 = vmul.f32 %v803_v16, %v790_v26  ;;  %2437 = vmatpush1.bf16.msra.mxu1 %v2436_v18  ;;  %v767_v26 = vrot.slane %v3473_v23, %v3521_v17 }
 0x1a9   :  { %v816_v40 = vmul.f32 %v799_v22, %v791_v27  ;;  %v763_v22 = vrot.slane %v3473_v23, %v3516_v12 }
 0x1aa   :  { %v472_v44 = vpop.permute.xlu1 %471  ;;  %887 = vmatprep.subr.mxu1 %v817_v36 }
 0x1ab   :  { %v517_v45 = vpop.permute.xlu0 %516  ;;  %v478_v49 = vsel %vm477_vm7, %v472_v44, %v3431_v6  ;;  %v479_v53 = vsel %vm477_vm7, %v3403_v51, %v472_v44  ;;  %v2909_v44 = vld [vmem:[#allocation4 + $0xc] ss:$16 sps:$4 sm:$0xff]  }
 0x1ac   :  { %v521_v54 = vsel %vm520_vm6, %v517_v45, %v3361_v35  ;;  %v522_v50 = vsel %vm520_vm6, %v3353_v29, %v517_v45  ;;  %v506_v55 = vmul.f32 %v495_v30, %v479_v53  ;;  %v507_v56 = vmul.f32 %v499_v31, %v478_v49  ;;  %888 = vmatpush1.msra.mxu1 %v816_v40  ;;  %v2935_v49 = vld [vmem:[#allocation4 + $0x88] ss:$16 sps:$4 sm:$0xff]   ;;  %v2939_v53 = vld [vmem:[#allocation4 + $0xac] ss:$16 sps:$4 sm:$0xff]  }
 0x1ad   :  { %v550_v58 = vmul.f32 %v539_v43, %v522_v50  ;;  %v551_v46 = vmul.f32 %v543_v28, %v521_v54  ;;  %2205 = vmatmul.mubr.msk.f32.vlgmr.msra.gmra.mrb[4].mxu1 %vm867_vm14, %v3548_v47  ;;  %v679_v35 = vrot.slane %v3446_v15, %v3521_v17  ;;  %v2941_v54 = vld [vmem:[#allocation4 + $0xa8] ss:$16 sps:$4 sm:$0xff]  }
 0x1ae   :  { %v561_v59 = vpop.permute.xlu1 %560  ;;  %1006 = vmatprep.mubr.f32.mxu1 %v3152_v0  ;;  %v2947_v50 = vld [vmem:[#allocation4 + $0xc8] ss:$16 sps:$4 sm:$0xff]  }
 0x1af   :  { %v2440_v6 = vpack.c.bf16 %v550_v58, %v506_v55  ;;  %v605_v60 = vpop.permute.xlu0 %604  ;;  %v2438_v51 = vpack.c.bf16 %v551_v46, %v507_v56  ;;  %v565_v29 = vsel %vm564_vm9, %v561_v59, %v3452_v20  ;;  %v566_v3 = vsel %vm564_vm9, %v3379_v42, %v561_v59  ;;  %v2951_v55 = vld [vmem:[#allocation4 + $0xec] ss:$16 sps:$4 sm:$0xff]   ;;  %v2953_v56 = vld [vmem:[#allocation4 + $0xe8] ss:$16 sps:$4 sm:$0xff]  }
 0x1b0   :  { %v609_v4 = vsel %vm608_vm8, %v605_v60, %v3433_v7  ;;  %v610_v5 = vsel %vm608_vm8, %v3405_v52, %v605_v60  ;;  %v594_v62 = vmul.f32 %v583_v38, %v566_v3  ;;  %v595_v15 = vmul.f32 %v587_v39, %v565_v29  ;;  %v2911_v39 = vld [vmem:[#allocation4 + $0x8] ss:$16 sps:$4 sm:$0xff]   ;;  %v2957_v58 = vld [vmem:[#allocation4 + $0x10c] ss:$16 sps:$4 sm:$0xff]  }
 0x1b1   :  { %v638_v9 = vmul.f32 %v627_v48, %v610_v5  ;;  %v639_v0 = vmul.f32 %v631_v37, %v609_v4  ;;  %2439 = vmatprep.subr.bf16.mxu1 %v2438_v51  ;;  %v719_v52 = vrot.slane %v3468_v32, %v3516_v12  ;;  %v2915_v48 = vld [vmem:[#allocation4 + $0x2c] ss:$16 sps:$4 sm:$0xff]   ;;  %v2965_v4 = vld [vmem:[#allocation4 + $0x128] ss:$16 sps:$4 sm:$0xff]  }
 0x1b2   :  { %2441 = vmatpush1.bf16.msra.mxu1 %v2440_v6  ;;  %v655_v20 = vpop.permute.xlu1 %654  ;;  %v2933_v37 = vld [vmem:[#allocation4 + $0x8c] ss:$16 sps:$4 sm:$0xff]  }
 0x1b3   :  { %v2444_v10 = vpack.c.bf16 %v638_v9, %v594_v62  ;;  %v699_v11 = vpop.permute.xlu0 %698  ;;  %v2442_v13 = vpack.c.bf16 %v639_v0, %v595_v15  ;;  %v657_v42 = vsel %vm656_vm10, %v3349_v24, %v655_v20  ;;  %v660_v7 = vsel %vm656_vm10, %v655_v20, %v3359_v34  ;;  %v2963_v29 = vld [vmem:[#allocation4 + $0x12c] ss:$16 sps:$4 sm:$0xff]   ;;  %v2971_v62 = vld [vmem:[#allocation4 + $0x148] ss:$16 sps:$4 sm:$0xff]  }
 0x1b4   :  { %v686_v16 = vmul.f32 %v675_v61, %v657_v42  ;;  %v687_v18 = vmul.f32 %v679_v35, %v660_v7  ;;  %v701_v24 = vsel %vm700_vm11, %v3377_v41, %v699_v11  ;;  %v704_v34 = vsel %vm700_vm11, %v699_v11, %v3454_v21  ;;  %v2959_v35 = vld [vmem:[#allocation4 + $0x108] ss:$16 sps:$4 sm:$0xff]   ;;  %v2969_v5 = vld [vmem:[#allocation4 + $0x14c] ss:$16 sps:$4 sm:$0xff]   ;;  %v2992_v7 = vld [vmem:[#allocation4 + $0x1c0] ss:$16 sps:$4 sm:$0xff]  }
 0x1b5   :  { %2443 = vmatprep.subr.bf16.mxu1 %v2442_v13  ;;  %v811_v41 = vrot.slane %v3507_v63, %v3521_v17  ;;  %v730_v43 = vmul.f32 %v719_v52, %v701_v24  ;;  %v731_v21 = vmul.f32 %v723_v14, %v704_v34  ;;  %v2975_v15 = vld [vmem:[#allocation4 + $0x16c] ss:$16 sps:$4 sm:$0xff]   ;;  %v2977_v9 = vld [vmem:[#allocation4 + $0x168] ss:$16 sps:$4 sm:$0xff]   ;;  %v2990_v13 = vld [vmem:[#allocation4 + $0x1c4] ss:$16 sps:$4 sm:$0xff]  }
 0x1b6   :  { %2445 = vmatpush1.bf16.msra.mxu1 %v2444_v10  ;;  %v2448_v32 = vpack.c.bf16 %v686_v16, %v3283_v2  ;;  %v743_v27 = vpop.permute.xlu1 %742  ;;  %v2446_v36 = vpack.c.bf16 %v687_v18, %v3281_v1  ;;  %v2981_v0 = vld [vmem:[#allocation4 + $0x18c] ss:$16 sps:$4 sm:$0xff]   ;;  %v2983_v10 = vld [vmem:[#allocation4 + $0x188] ss:$16 sps:$4 sm:$0xff]   ;;  %2511 = vmatprep.subr.bf16.mxu0 %v2990_v13  ;;  %v2996_v14 = vld [vmem:[#allocation4 + $0x1e4] ss:$16 sps:$4 sm:$0xff]  }
 0x1b7   :  { %v787_v30 = vpop.permute.xlu0 %786  ;;  %v745_v31 = vsel %vm744_vm12, %v3491_v57, %v743_v27  ;;  %v748_v23 = vsel %vm744_vm12, %v743_v27, %v3509_v8  ;;  %v807_v57 = vrot.slane %v3507_v63, %v3516_v12  ;;  %v2921_v63 = vld [vmem:[#allocation4 + $0x4c] ss:$16 sps:$4 sm:$0xff]   ;;  %v2989_v11 = vld [vmem:[#allocation4 + $0x1a8] ss:$16 sps:$4 sm:$0xff]   ;;  %2513 = vmatpush1.bf16.msra.mxu0 %v2992_v7  ;;  %v2998_v18 = vld [vmem:[#allocation4 + $0x1e0] ss:$16 sps:$4 sm:$0xff]  }
 0x1b8   :  { %v774_v28 = vmul.f32 %v763_v22, %v745_v31  ;;  %v775_v38 = vmul.f32 %v767_v26, %v748_v23  ;;  %2447 = vmatprep.subr.bf16.mxu1 %v2446_v36  ;;  %v792_v1 = vsel %vm788_vm13, %v787_v30, %v3527_v25  ;;  %v789_v8 = vsel %vm788_vm13, %v3523_v19, %v787_v30  ;;  %v2917_v25 = vld [vmem:[#allocation4 + $0x28] ss:$16 sps:$4 sm:$0xff]   ;;  %v2927_v12 = vld [vmem:[#allocation4 + $0x6c] ss:$16 sps:$4 sm:$0xff]   ;;  %v3002_v26 = vld [vmem:[#allocation4 + $0x204] ss:$16 sps:$4 sm:$0xff]  }
 0x1b9   :  { %v819_v17 = vmul.f32 %v811_v41, %v792_v1  ;;  %v818_v45 = vmul.f32 %v807_v57, %v789_v8  ;;  %v2929_v19 = vld [vmem:[#allocation4 + $0x68] ss:$16 sps:$4 sm:$0xff]   ;;  %v2987_v20 = vld [vmem:[#allocation4 + $0x1ac] ss:$16 sps:$4 sm:$0xff]   ;;  %2515 = vmatprep.subr.bf16.mxu0 %v2996_v14  ;;  %v3004_v1 = vld [vmem:[#allocation4 + $0x200] ss:$16 sps:$4 sm:$0xff]  }
 0x1ba   :  { %2449 = vmatpush1.bf16.msra.mxu1 %v2448_v32  ;;  %v2452_v2 = vpack.c.bf16 %v774_v28, %v730_v43  ;;  %v2450_v40 = vpack.c.bf16 %v775_v38, %v731_v21  ;;  %v2993_v42 = vld [vmem:[#allocation4 + $0x1cc] ss:$16 sps:$4 sm:$0xff]   ;;  %v2995_v52 = vld [vmem:[#allocation4 + $0x1c8] ss:$16 sps:$4 sm:$0xff]   ;;  %v3008_v57 = vld [vmem:[#allocation4 + $0x224] ss:$16 sps:$4 sm:$0xff]  }
 0x1bb   :  { %v2999_v16 = vld [vmem:[#allocation4 + $0x1ec] ss:$16 sps:$4 sm:$0xff]   ;;  %v3001_v22 = vld [vmem:[#allocation4 + $0x1e8] ss:$16 sps:$4 sm:$0xff]   ;;  %2517 = vmatpush1.bf16.msra.mxu0 %v2998_v18 }
 0x1bc   :  { %2451 = vmatprep.subr.bf16.mxu1 %v2450_v40  ;;  %v3005_v24 = vld [vmem:[#allocation4 + $0x20c] ss:$16 sps:$4 sm:$0xff]   ;;  %2519 = vmatprep.subr.bf16.mxu0 %v3002_v26  ;;  %v3055_v13 = vld [vmem:[#allocation4 + $0x308] ss:$16 sps:$4 sm:$0xff]  }
 0x1bd   :  { %v3011_v8 = vld [vmem:[#allocation4 + $0x22c] ss:$16 sps:$4 sm:$0xff]   ;;  %v3061_v14 = vld [vmem:[#allocation4 + $0x328] ss:$16 sps:$4 sm:$0xff]  }
 0x1be   :  { %2453 = vmatpush1.bf16.msra.mxu1 %v2452_v2  ;;  %v3007_v2 = vld [vmem:[#allocation4 + $0x208] ss:$16 sps:$4 sm:$0xff]   ;;  %v3059_v7 = vld [vmem:[#allocation4 + $0x32c] ss:$16 sps:$4 sm:$0xff]  }
 0x1bf   :  { %958 = vmatprep.subr.mxu1 %v819_v17  ;;  %v3010_v17 = vld [vmem:[#allocation4 + $0x220] ss:$16 sps:$4 sm:$0xff]   ;;  %v3065_v18 = vld [vmem:[#allocation4 + $0x34c] ss:$16 sps:$4 sm:$0xff]   ;;  %v3067_v26 = vld [vmem:[#allocation4 + $0x348] ss:$16 sps:$4 sm:$0xff]  }
 0x1c2   :  { %959 = vmatpush1.msra.mxu1 %v818_v45  ;;  %v3014_v45 = vld [vmem:[#allocation4 + $0x244] ss:$16 sps:$4 sm:$0xff]  }
 0x1c3   :  { %2206 = vmatmul.mubr.msk.f32.vlgmr.msra.gmra.mrb[6].mxu1 %vm867_vm14, %v3548_v47  ;;  %2583 = vmatprep.subr.bf16.mxu1 %v2909_v44  ;;  %v2945_v47 = vld [vmem:[#allocation4 + $0xcc] ss:$16 sps:$4 sm:$0xff]   ;;  %v3013_v44 = vld [vmem:[#allocation4 + $0x228] ss:$16 sps:$4 sm:$0xff]  }
 0x1c4   :  { %2585 = vmatpush1.bf16.msra.mxu1 %v2911_v39  ;;  %v3017_v39 = vld [vmem:[#allocation4 + $0x24c] ss:$16 sps:$4 sm:$0xff]  }
 0x1c5   :  { %2587 = vmatprep.subr.bf16.mxu1 %v2915_v48  ;;  %v3016_v48 = vld [vmem:[#allocation4 + $0x240] ss:$16 sps:$4 sm:$0xff]  }
 0x1c7   :  { %v3629_v34 = vpop.permute.xlu1 %864 }
 0x1c8   :  { %2589 = vmatpush1.bf16.msra.mxu1 %v2917_v25  ;;  %v3019_v25 = vld [vmem:[#allocation4 + $0x248] ss:$16 sps:$4 sm:$0xff]  }
 0x1c9   :  { %2591 = vmatprep.subr.bf16.mxu1 %v2921_v63  ;;  %v3020_v63 = vld [vmem:[#allocation4 + $0x264] ss:$16 sps:$4 sm:$0xff]  }
 0x1cc   :  { %2593 = vmatpush1.bf16.msra.mxu1 %v2923_v33  ;;  %v3023_v33 = vld [vmem:[#allocation4 + $0x26c] ss:$16 sps:$4 sm:$0xff]  }
 0x1cd   :  { %2595 = vmatprep.subr.bf16.mxu1 %v2927_v12 }
 0x1d0   :  { %2597 = vmatpush1.bf16.msra.mxu1 %v2929_v19  ;;  %v3022_v19 = vld [vmem:[#allocation4 + $0x260] ss:$16 sps:$4 sm:$0xff]  }
 0x1d1   :  { %2599 = vmatprep.subr.bf16.mxu1 %v2933_v37  ;;  %v3025_v37 = vld [vmem:[#allocation4 + $0x268] ss:$16 sps:$4 sm:$0xff]  }
 0x1d4   :  { %2601 = vmatpush1.bf16.msra.mxu1 %v2935_v49 }
 0x1d5   :  { %2603 = vmatprep.subr.bf16.mxu1 %v2939_v53  ;;  %v3026_v53 = vld [vmem:[#allocation4 + $0x284] ss:$16 sps:$4 sm:$0xff]  }
 0x1d8   :  { %2605 = vmatpush1.bf16.msra.mxu1 %v2941_v54  ;;  %v3029_v54 = vld [vmem:[#allocation4 + $0x28c] ss:$16 sps:$4 sm:$0xff]  }
 0x1d9   :  { %2607 = vmatprep.subr.bf16.mxu1 %v2945_v47 }
 0x1dc   :  { %2609 = vmatpush1.bf16.msra.mxu1 %v2947_v50  ;;  %v3028_v50 = vld [vmem:[#allocation4 + $0x280] ss:$16 sps:$4 sm:$0xff]  }
 0x1dd   :  { %2611 = vmatprep.subr.bf16.mxu1 %v2951_v55  ;;  %v2257_v46 = vpop.f32.mrb[2].mxu0 }
 0x1de   :  { %v2292_v6 = vpop.f32.mrb[2].mxu1  ;;  %v2258_v59 = vpop.f32.mrb[3].mxu0 }
 0x1df   :  { %v2293_v60 = vpop.f32.mrb[3].mxu1  ;;  %v2259_v51 = vadd.f32 %v2258_v59, %v2257_v46  ;;  %v3035_v46 = vld [vmem:[#allocation4 + $0x2ac] ss:$16 sps:$4 sm:$0xff]  }
 0x1e0   :  { %v2294_v61 = vadd.f32 %v2293_v60, %v2292_v6  ;;  %2613 = vmatpush1.bf16.msra.mxu1 %v2953_v56  ;;  %v3031_v56 = vld [vmem:[#allocation4 + $0x288] ss:$16 sps:$4 sm:$0xff]   ;;  %v3034_v60 = vld [vmem:[#allocation4 + $0x2a0] ss:$16 sps:$4 sm:$0xff]  }
 0x1e1   :  { %2615 = vmatprep.subr.bf16.mxu1 %v2957_v58  ;;  %v3032_v58 = vld [vmem:[#allocation4 + $0x2a4] ss:$16 sps:$4 sm:$0xff]  }
 0x1e2   :  { %v3627_v3 = vadd.f32 %v2294_v61, %v2259_v51  ;;  %v3037_v51 = vld [vmem:[#allocation4 + $0x2a8] ss:$16 sps:$4 sm:$0xff]  }
 0x1e4   :  { %2617 = vmatpush1.bf16.msra.mxu1 %v2959_v35  ;;  %v3038_v35 = vld [vmem:[#allocation4 + $0x2c4] ss:$16 sps:$4 sm:$0xff]  }
 0x1e5   :  { %2619 = vmatprep.subr.bf16.mxu1 %v2963_v29  ;;  %v3041_v29 = vld [vmem:[#allocation4 + $0x2cc] ss:$16 sps:$4 sm:$0xff]  }
 0x1e8   :  { %2621 = vmatpush1.bf16.msra.mxu1 %v2965_v4  ;;  %v3040_v4 = vld [vmem:[#allocation4 + $0x2c0] ss:$16 sps:$4 sm:$0xff]  }
 0x1e9   :  { %2623 = vmatprep.subr.bf16.mxu1 %v2969_v5  ;;  %v3043_v5 = vld [vmem:[#allocation4 + $0x2c8] ss:$16 sps:$4 sm:$0xff]  }
 0x1ec   :  { %2625 = vmatpush1.bf16.msra.mxu1 %v2971_v62  ;;  %v3044_v62 = vld [vmem:[#allocation4 + $0x2e4] ss:$16 sps:$4 sm:$0xff]  }
 0x1ed   :  { %2627 = vmatprep.subr.bf16.mxu1 %v2975_v15  ;;  %v3047_v15 = vld [vmem:[#allocation4 + $0x2ec] ss:$16 sps:$4 sm:$0xff]  }
 0x1f0   :  { %2629 = vmatpush1.bf16.msra.mxu1 %v2977_v9  ;;  %v3046_v9 = vld [vmem:[#allocation4 + $0x2e0] ss:$16 sps:$4 sm:$0xff]  }
 0x1f1   :  { %2631 = vmatprep.subr.bf16.mxu1 %v2981_v0  ;;  %v3049_v0 = vld [vmem:[#allocation4 + $0x2e8] ss:$16 sps:$4 sm:$0xff]  }
 0x1f4   :  { %2633 = vmatpush1.bf16.msra.mxu1 %v2983_v10  ;;  %v3050_v10 = vld [vmem:[#allocation4 + $0x304] ss:$16 sps:$4 sm:$0xff]  }
 0x1f5   :  { %2635 = vmatprep.subr.bf16.mxu1 %v2987_v20  ;;  %v3053_v20 = vld [vmem:[#allocation4 + $0x30c] ss:$16 sps:$4 sm:$0xff]  }
 0x1f8   :  { %2637 = vmatpush1.bf16.msra.mxu1 %v2989_v11  ;;  %v3052_v11 = vld [vmem:[#allocation4 + $0x300] ss:$16 sps:$4 sm:$0xff]  }
 0x1f9   :  { %2639 = vmatprep.subr.bf16.mxu1 %v2993_v42  ;;  %v3056_v42 = vld [vmem:[#allocation4 + $0x324] ss:$16 sps:$4 sm:$0xff]  }
 0x1fc   :  { %2641 = vmatpush1.bf16.msra.mxu1 %v2995_v52  ;;  %v3058_v52 = vld [vmem:[#allocation4 + $0x320] ss:$16 sps:$4 sm:$0xff]  }
 0x1fd   :  { %2643 = vmatprep.subr.bf16.mxu1 %v2999_v16  ;;  %v3062_v16 = vld [vmem:[#allocation4 + $0x344] ss:$16 sps:$4 sm:$0xff]  }
 0x200   :  { %2645 = vmatpush1.bf16.msra.mxu1 %v3001_v22  ;;  %v3064_v22 = vld [vmem:[#allocation4 + $0x340] ss:$16 sps:$4 sm:$0xff]  }
 0x201   :  { %2647 = vmatprep.subr.bf16.mxu1 %v3005_v24  ;;  %v3068_v24 = vld [vmem:[#allocation4 + $0x364] ss:$16 sps:$4 sm:$0xff]  }
 0x280   :  { %v937_v32 = vpop.f32.mrb[4].mxu1 }
 0x281   :  { %v938_v27 = vadd.f32 %v937_v32, %v3629_v34  ;;  %v939_v30 = vpop.f32.mrb[5].mxu1  ;;  %v3071_v32 = vld [vmem:[#allocation4 + $0x36c] ss:$16 sps:$4 sm:$0xff]  }
 0x282   :  { %v940_v36 = vadd.f32 %v939_v30, %v3629_v34  ;;  %v3073_v30 = vld [vmem:[#allocation4 + $0x368] ss:$16 sps:$4 sm:$0xff]  }
 0x283   :  { %vm1013_vm15 = vcmp.ge.f32.partialorder %v938_v27, 0.0  ;;  %v1017_v31 = vmul.f32 0.2, %v938_v27 }
 0x284   :  { %vm1014_vm0 = vcmp.ge.f32.partialorder %v940_v36, 0.0  ;;  %v1018_v23 = vmul.f32 0.2, %v940_v36 }
 0x285   :  { %v1021_v41 = vsel %vm1013_vm15, %v938_v27, %v1017_v31  ;;  %v3070_v27 = vld [vmem:[#allocation4 + $0x360] ss:$16 sps:$4 sm:$0xff]   ;;  %v3077_v31 = vld [vmem:[#allocation4 + $0x38c] ss:$16 sps:$4 sm:$0xff]  }
 0x286   :  { %v1025_v43 = vmul.f32 1.4142135, %v1021_v41  ;;  %v1022_v21 = vsel %vm1014_vm0, %v940_v36, %v1018_v23  ;;  %v3074_v36 = vld [vmem:[#allocation4 + $0x384] ss:$16 sps:$4 sm:$0xff]   ;;  %v3076_v23 = vld [vmem:[#allocation4 + $0x380] ss:$16 sps:$4 sm:$0xff]  }
 0x287   :  { %v1026_v28 = vmul.f32 1.4142135, %v1022_v21  ;;  %v3079_v41 = vld [vmem:[#allocation4 + $0x388] ss:$16 sps:$4 sm:$0xff]   ;;  %v3083_v21 = vld [vmem:[#allocation4 + $0x3ac] ss:$16 sps:$4 sm:$0xff]  }
 0x288   :  { %v2207_v40 = vclamps-f32 %v1025_v43, 256.0  ;;  %v3080_v43 = vld [vmem:[#allocation4 + $0x3a4] ss:$16 sps:$4 sm:$0xff]  }
 0x289   :  { %v2208_v38 = vclamps-f32 %v1026_v28, 256.0 }
 0x28b   :  { %1485 = vmatprep.mubr.f32.mxu0 %v2208_v38  ;;  %1627 = vmatprep.mubr.f32.mxu1 %v2208_v38  ;;  %v3082_v38 = vld [vmem:[#allocation4 + $0x3a0] ss:$16 sps:$4 sm:$0xff]  }
 0x28c   :  { %1486 = vmatmul.mubr.f32.vlgmr.msra.gmra.mrb[4].mxu0 %v2207_v40  ;;  %1628 = vmatmul.mubr.f32.vlgmr.msra.gmra.mrb[8].mxu1 %v2207_v40  ;;  %v3089_v40 = vld [vmem:[#allocation4 + $0x3cc] ss:$16 sps:$4 sm:$0xff]  }
 0x28d   :  { %2521 = vmatpush1.bf16.msra.mxu0 %v3004_v1  ;;  %2649 = vmatpush1.bf16.msra.mxu1 %v3007_v2  ;;  %v3085_v1 = vld [vmem:[#allocation4 + $0x3a8] ss:$16 sps:$4 sm:$0xff]   ;;  %v3086_v2 = vld [vmem:[#allocation4 + $0x3c4] ss:$16 sps:$4 sm:$0xff]  }
 0x28e   :  { %2523 = vmatprep.subr.bf16.mxu0 %v3008_v57  ;;  %2651 = vmatprep.subr.bf16.mxu1 %v3011_v8  ;;  %v3088_v8 = vld [vmem:[#allocation4 + $0x3c0] ss:$16 sps:$4 sm:$0xff]  }
 0x291   :  { %2525 = vmatpush1.bf16.msra.mxu0 %v3010_v17  ;;  %2653 = vmatpush1.bf16.msra.mxu1 %v3013_v44  ;;  %v3091_v17 = vld [vmem:[#allocation4 + $0x3c8] ss:$16 sps:$4 sm:$0xff]   ;;  %v3092_v44 = vld [vmem:[#allocation4 + $0x3e4] ss:$16 sps:$4 sm:$0xff]  }
 0x292   :  { %2527 = vmatprep.subr.bf16.mxu0 %v3014_v45  ;;  %2655 = vmatprep.subr.bf16.mxu1 %v3017_v39  ;;  %v3095_v45 = vld [vmem:[#allocation4 + $0x3ec] ss:$16 sps:$4 sm:$0xff]  }
 0x295   :  { %2529 = vmatpush1.bf16.msra.mxu0 %v3016_v48  ;;  %2657 = vmatpush1.bf16.msra.mxu1 %v3019_v25  ;;  %v3097_v48 = vld [vmem:[#allocation4 + $0x3e8] ss:$16 sps:$4 sm:$0xff]  }
 0x296   :  { %v3633_v12 = vpop.f32.mrb[6].mxu1  ;;  %2531 = vmatprep.subr.bf16.mxu0 %v3020_v63  ;;  %2659 = vmatprep.subr.bf16.mxu1 %v3023_v33 }
 0x297   :  { %v1010_v49 = vpop.f32.mrb[7].mxu1  ;;  %v1009_v28 = vadd.f32 %v3633_v12, %v3629_v34 }
 0x298   :  { %v1011_v47 = vadd.f32 %v1010_v49, %v3629_v34  ;;  %v3094_v34 = vld [vmem:[#allocation4 + $0x3e0] ss:$16 sps:$4 sm:$0xff]  }
 0x299   :  { %2533 = vmatpush1.bf16.msra.mxu0 %v3022_v19  ;;  %2661 = vmatpush1.bf16.msra.mxu1 %v3025_v37  ;;  %v1019_v57 = vmul.f32 0.2, %v1009_v28  ;;  %vm1015_vm2 = vcmp.ge.f32.partialorder %v1009_v28, 0.0 }
 0x29a   :  { %vm1016_vm1 = vcmp.ge.f32.partialorder %v1011_v47, 0.0  ;;  %v1020_v55 = vmul.f32 0.2, %v1011_v47  ;;  %2535 = vmatprep.subr.bf16.mxu0 %v3026_v53  ;;  %2663 = vmatprep.subr.bf16.mxu1 %v3029_v54  ;;  %v465_v54 = vld [vmem:[%s3741_s7] sm:$0xff] }
 0x29b   :  { %v1023_v39 = vsel %vm1015_vm2, %v1009_v28, %v1019_v57  ;;  %v2213_v28 = vld [vmem:[%s3745_s11 + $0x2] ss:$0 sm:$0xff] }
 0x29c   :  { %v1024_v6 = vsel %vm1016_vm1, %v1011_v47, %v1020_v55  ;;  %v1027_v25 = vmul.f32 1.4142135, %v1023_v39  ;;  %v1919_v47 = vld [vmem:[%s3740_s6] sm:$0xff]  ;;  %v1920_v55 = vld [vmem:[%s3740_s6 + $0x8] sm:$0xff] }
 0x29d   :  { %v1028_v59 = vmul.f32 1.4142135, %v1024_v6  ;;  %2537 = vmatpush1.bf16.msra.mxu0 %v3028_v50  ;;  %2665 = vmatpush1.bf16.msra.mxu1 %v3031_v56  ;;  %v466_v50 = vld [vmem:[%s3741_s7 + $0x8] sm:$0xff]  ;;  %v2211_v56 = vld [vmem:[%s3745_s11] ss:$0 sm:$0xff] }
 0x29e   :  { %2539 = vmatprep.subr.bf16.mxu0 %v3032_v58  ;;  %2667 = vmatprep.subr.bf16.mxu1 %v3035_v46  ;;  %v2209_v63 = vclamps-f32 %v1027_v25, 256.0 }
 0x29f   :  { %v2210_v61 = vclamps-f32 %v1028_v59, 256.0 }
 0x2a1   :  { %1556 = vmatprep.mubr.f32.mxu0 %v2210_v61  ;;  %1698 = vmatprep.mubr.f32.mxu1 %v2210_v61 }
 0x2a2   :  { %2541 = vmatpush1.bf16.msra.mxu0 %v3034_v60  ;;  %2669 = vmatpush1.bf16.msra.mxu1 %v3037_v51 }
 0x2a3   :  { %2543 = vmatprep.subr.bf16.mxu0 %v3038_v35  ;;  %2671 = vmatprep.subr.bf16.mxu1 %v3041_v29 }
 0x2a6   :  { %2545 = vmatpush1.bf16.msra.mxu0 %v3040_v4  ;;  %2673 = vmatpush1.bf16.msra.mxu1 %v3043_v5  ;;  %v2215_v4 = vld [vmem:[%s3745_s11 + $0x5] ss:$0 sm:$0xff] }
 0x2a7   :  { %2547 = vmatprep.subr.bf16.mxu0 %v3044_v62  ;;  %2675 = vmatprep.subr.bf16.mxu1 %v3047_v15 }
 0x2aa   :  { %2549 = vmatpush1.bf16.msra.mxu0 %v3046_v9  ;;  %2677 = vmatpush1.bf16.msra.mxu1 %v3049_v0 }
 0x2ab   :  { %2551 = vmatprep.subr.bf16.mxu0 %v3050_v10  ;;  %2679 = vmatprep.subr.bf16.mxu1 %v3053_v20  ;;  %v2212_v10 = vld [vmem:[%s3745_s11 + $0x1] ss:$0 sm:$0xff] }
 0x2ae   :  { %2553 = vmatpush1.bf16.msra.mxu0 %v3052_v11  ;;  %2681 = vmatpush1.bf16.msra.mxu1 %v3055_v13 }
 0x2af   :  { %2555 = vmatprep.subr.bf16.mxu0 %v3056_v42  ;;  %2683 = vmatprep.subr.bf16.mxu1 %v3059_v7 }
 0x2b2   :  { %2557 = vmatpush1.bf16.msra.mxu0 %v3058_v52  ;;  %2685 = vmatpush1.bf16.msra.mxu1 %v3061_v14 }
 0x2b3   :  { %2559 = vmatprep.subr.bf16.mxu0 %v3062_v16  ;;  %2687 = vmatprep.subr.bf16.mxu1 %v3065_v18 }
 0x2b6   :  { %2561 = vmatpush1.bf16.msra.mxu0 %v3064_v22  ;;  %2689 = vmatpush1.bf16.msra.mxu1 %v3067_v26 }
 0x2b7   :  { %2563 = vmatprep.subr.bf16.mxu0 %v3068_v24  ;;  %2691 = vmatprep.subr.bf16.mxu1 %v3071_v32 }
 0x2ba   :  { %2565 = vmatpush1.bf16.msra.mxu0 %v3070_v27  ;;  %2693 = vmatpush1.bf16.msra.mxu1 %v3073_v30 }
 0x2bb   :  { %2567 = vmatprep.subr.bf16.mxu0 %v3074_v36  ;;  %2695 = vmatprep.subr.bf16.mxu1 %v3077_v31  ;;  %v2216_v36 = vld [vmem:[%s3745_s11 + $0x6] ss:$0 sm:$0xff] }
 0x2be   :  { %2569 = vmatpush1.bf16.msra.mxu0 %v3076_v23  ;;  %2697 = vmatpush1.bf16.msra.mxu1 %v3079_v41 }
 0x2bf   :  { %2571 = vmatprep.subr.bf16.mxu0 %v3080_v43  ;;  %2699 = vmatprep.subr.bf16.mxu1 %v3083_v21 }
 0x2c2   :  { %2573 = vmatpush1.bf16.msra.mxu0 %v3082_v38  ;;  %2701 = vmatpush1.bf16.msra.mxu1 %v3085_v1 }
 0x2c3   :  { %2575 = vmatprep.subr.bf16.mxu0 %v3086_v2  ;;  %2703 = vmatprep.subr.bf16.mxu1 %v3089_v40 }
 0x2c6   :  { %2577 = vmatpush1.bf16.msra.mxu0 %v3088_v8  ;;  %2705 = vmatpush1.bf16.msra.mxu1 %v3091_v17 }
 0x2c7   :  { %2579 = vmatprep.subr.bf16.mxu0 %v3092_v44  ;;  %2707 = vmatprep.subr.bf16.mxu1 %v3095_v45 }
 0x2ca   :  { %2581 = vmatpush1.bf16.msra.mxu0 %v3094_v34  ;;  %2709 = vmatpush1.bf16.msra.mxu1 %v3097_v48 }
 0x2cb   :  { %2353 = vmatprep.subr.mxu1 %v3627_v3 }
 0x2cd   :  { %1557 = vmatmul.mubr.f32.vlgmr.msra.gmra.mrb[4].mxu0 %v2209_v63  ;;  %1699 = vmatmul.mubr.f32.vlgmr.msra.gmra.mrb[8].mxu1 %v2209_v63 }
 0x2ce   :  { %2354 = vmatpush3.msra.mxu1 %v3627_v3  ;;  %v1878_v3 = vld [vmem:[%s3739_s5 + $0x8] sm:$0xff]  ;;  %2355 = vmatprep.mubr.msk.f32.mxu1 %vm2098_vm3, %v465_v54  ;;  %v2214_v54 = vld [vmem:[%s3745_s11 + $0x3] ss:$0 sm:$0xff] }
 0x2cf   :  { %2002 = vmatprep.mubr.f32.mxu0 %v1878_v3 }
 0x2d1   :  { %2356 = vmatmul.mubr.msk.f32.vlgmr.msra.gmra.mrb[10].mxu1 %vm2098_vm3, %v466_v50 }
 0x3a0   :  { %v1558_v33 = vpop.f32.mrb[4].mxu0  ;;  %v3640_v12 = vpop.f32.mrb[8].mxu1 }
 0x3a1   :  { %v3642_v19 = vpop.f32.mrb[9].mxu1  ;;  %1705 = vrot.lane.b32.xlu0 %v1558_v33, %s3161_s3  ;;  %v1560_v37 = vpop.f32.mrb[5].mxu0 }
 0x3a2   :  { %1707 = vrot.lane.b32.xlu1 %v1560_v37, %s3161_s3  ;;  %v2710_v49 = vpack.c.bf16 %v1560_v37, %v1558_v33  ;;  %v2714_v53 = vpack.c.bf16 %v3642_v19, %v3640_v12 }
 0x3a4   :  { %2711 = vmatprep.subr.bf16.mxu0 %v2710_v49 }
 0x3a5   :  { %1709 = vrot.lane.b32.xlu0 %v3640_v12, %s3161_s3 }
 0x3a6   :  { %1711 = vrot.lane.b32.xlu1 %v3642_v19, %s3161_s3 }
 0x3a9   :  { %1793 = vrot.lane.b32.xlu0 %v1558_v33, %s3156_s2 }
 0x3aa   :  { %1795 = vrot.lane.b32.xlu1 %v1560_v37, %s3156_s2 }
 0x3ad   :  { %1726 = vrot.lane.b32.xlu0 %v1558_v33, %s3151_s22 }
 0x3ae   :  { %1728 = vrot.lane.b32.xlu1 %v1560_v37, %s3151_s22 }
 0x3b1   :  { %1797 = vrot.lane.b32.xlu0 %v3640_v12, %s3156_s2 }
 0x3b2   :  { %1799 = vrot.lane.b32.xlu1 %v3642_v19, %s3156_s2  ;;  %s3164_s2 = smov 120  }
 0x3b5   :  { %1730 = vrot.lane.b32.xlu0 %v3640_v12, %s3151_s22 }
 0x3b6   :  { %1732 = vrot.lane.b32.xlu1 %v3642_v19, %s3151_s22 }
 0x3b9   :  { %1814 = vrot.lane.b32.xlu0 %v1558_v33, %s3162_s23 }
 0x3ba   :  { %1816 = vrot.lane.b32.xlu1 %v1560_v37, %s3162_s23 }
 0x3bd   :  { %1747 = vrot.lane.b32.xlu0 %v1558_v33, %s3163_s24 }
 0x3be   :  { %1749 = vrot.lane.b32.xlu1 %v1560_v37, %s3163_s24 }
 0x3c1   :  { %1818 = vrot.lane.b32.xlu0 %v3640_v12, %s3162_s23 }
 0x3c2   :  { %1820 = vrot.lane.b32.xlu1 %v3642_v19, %s3162_s23 }
 0x3c5   :  { %1751 = vrot.lane.b32.xlu0 %v3640_v12, %s3163_s24 }
 0x3c6   :  { %1753 = vrot.lane.b32.xlu1 %v3642_v19, %s3163_s24 }
 0x3c9   :  { %1835 = vrot.lane.b32.xlu0 %v1558_v33, %s3164_s2 }
 0x3ca   :  { %1837 = vrot.lane.b32.xlu1 %v1560_v37, %s3164_s2 }
 0x3cd   :  { %1768 = vrot.lane.b32.xlu0 %v1558_v33, %s3157_s20 }
 0x3ce   :  { %1770 = vrot.lane.b32.xlu1 %v1560_v37, %s3157_s20 }
 0x3d1   :  { %1839 = vrot.lane.b32.xlu0 %v3640_v12, %s3164_s2 }
 0x3d2   :  { %1841 = vrot.lane.b32.xlu1 %v3642_v19, %s3164_s2 }
 0x3d5   :  { %1772 = vrot.lane.b32.xlu0 %v3640_v12, %s3157_s20 }
 0x3d6   :  { %1774 = vrot.lane.b32.xlu1 %v3642_v19, %s3157_s20 }
 0x3d9   :  { %1856 = vrot.lane.b32.xlu0 %v1558_v33, %s3165_s26 }
 0x3da   :  { %1858 = vrot.lane.b32.xlu1 %v1560_v37, %s3165_s26 }
 0x3dd   :  { %1860 = vrot.lane.b32.xlu0 %v3640_v12, %s3165_s26  ;;  %v2217_v12 = vld [vmem:[%s3745_s11 + $0x7] ss:$0 sm:$0xff] }
 0x3de   :  { %1862 = vrot.lane.b32.xlu1 %v3642_v19, %s3165_s26 }
 0x3e1   :  { %1923 = vperm.xlu0 %2902, %v1919_v47  }
 0x3e2   :  { %1928 = vperm.xlu1 %2903, %v1920_v55  }
 0x413   :  { %v1706_v58 = vpop.permute.xlu0 %1705 }
 0x414   :  { %v1718_v46 = vmul.f32 %v2211_v56, %v1706_v58  ;;  %v1708_v6 = vpop.permute.xlu1 %1707 }
 0x415   :  { %v1719_v59 = vmul.f32 %v2211_v56, %v1708_v6 }
 0x417   :  { %v2712_v60 = vpack.c.bf16 %v1719_v59, %v1718_v46  ;;  %v1710_v51 = vpop.permute.xlu0 %1709 }
 0x418   :  { %v1720_v61 = vmul.f32 %v2211_v56, %v1710_v51  ;;  %v1712_v35 = vpop.permute.xlu1 %1711 }
 0x419   :  { %v1721_v29 = vmul.f32 %v2211_v56, %v1712_v35  ;;  %2713 = vmatpush3.bf16.msra.mxu0 %v2712_v60 }
 0x41a   :  { %2715 = vmatprep.subr.bf16.mxu0 %v2714_v53 }
 0x41b   :  { %v2716_v5 = vpack.c.bf16 %v1721_v29, %v1720_v61  ;;  %v1794_v62 = vpop.permute.xlu0 %1793 }
 0x41c   :  { %v1806_v15 = vmul.f32 %v2215_v4, %v1794_v62  ;;  %v1796_v9 = vpop.permute.xlu1 %1795  ;;  %v2218_v62 = vld [vmem:[%s3745_s11 + $0x8] ss:$0 sm:$0xff] }
 0x41d   :  { %v1807_v0 = vmul.f32 %v2215_v4, %v1796_v9  ;;  %2717 = vmatpush3.bf16.msra.mxu0 %v2716_v5 }
 0x41f   :  { %v2718_v20 = vpack.c.bf16 %v1807_v0, %v1806_v15  ;;  %v1727_v11 = vpop.permute.xlu0 %1726 }
 0x420   :  { %v1739_v13 = vmul.f32 %v2212_v10, %v1727_v11  ;;  %v1729_v42 = vpop.permute.xlu1 %1728  ;;  %v1877_v11 = vld [vmem:[%s3739_s5] sm:$0xff] }
 0x421   :  { %v1740_v7 = vmul.f32 %v2212_v10, %v1729_v42  ;;  %2719 = vmatprep.subr.bf16.mxu0 %v2718_v20 }
 0x423   :  { %v2720_v52 = vpack.c.bf16 %v1740_v7, %v1739_v13  ;;  %v1798_v14 = vpop.permute.xlu0 %1797  ;;  %v1881_v13 = vld [vmem:[%s3739_s5 + $0x20] sm:$0xff] }
 0x424   :  { %v1808_v16 = vmul.f32 %v2215_v4, %v1798_v14  ;;  %v1800_v18 = vpop.permute.xlu1 %1799 }
 0x425   :  { %v1809_v22 = vmul.f32 %v2215_v4, %v1800_v18  ;;  %2721 = vmatpush3.bf16.msra.mxu0 %v2720_v52  ;;  %v1880_v18 = vld [vmem:[%s3739_s5 + $0x18] sm:$0xff] }
 0x427   :  { %v2722_v26 = vpack.c.bf16 %v1809_v22, %v1808_v16  ;;  %v1731_v24 = vpop.permute.xlu0 %1730  ;;  %v1879_v22 = vld [vmem:[%s3739_s5 + $0x10] sm:$0xff] }
 0x428   :  { %v1741_v32 = vmul.f32 %v2212_v10, %v1731_v24  ;;  %v1733_v27 = vpop.permute.xlu1 %1732  ;;  %v1882_v24 = vld [vmem:[%s3739_s5 + $0x28] sm:$0xff] }
 0x429   :  { %v1742_v30 = vmul.f32 %v2212_v10, %v1733_v27  ;;  %2723 = vmatprep.subr.bf16.mxu0 %v2722_v26 }
 0x42b   :  { %v2724_v31 = vpack.c.bf16 %v1742_v30, %v1741_v32  ;;  %v1815_v23 = vpop.permute.xlu0 %1814  ;;  %v2357_v32 = vpop.f32.mrb[10].mxu1 }
 0x42c   :  { %v1827_v41 = vmul.f32 %v2216_v36, %v1815_v23  ;;  %v1817_v43 = vpop.permute.xlu1 %1816  ;;  %v2171_v27 = vpop.f32.mrb[11].mxu1 }
 0x42d   :  { %v1828_v21 = vmul.f32 %v2216_v36, %v1817_v43  ;;  %2725 = vmatpush3.bf16.msra.mxu0 %v2724_v31 }
 0x42f   :  { %v2726_v38 = vpack.c.bf16 %v1828_v21, %v1827_v41  ;;  %v1748_v1 = vpop.permute.xlu0 %1747 }
 0x430   :  { %v1760_v2 = vmul.f32 %v2213_v28, %v1748_v1  ;;  %v1750_v40 = vpop.permute.xlu1 %1749 }
 0x431   :  { %v1761_v57 = vmul.f32 %v2213_v28, %v1750_v40  ;;  %2727 = vmatprep.subr.bf16.mxu0 %v2726_v38 }
 0x433   :  { %v2728_v8 = vpack.c.bf16 %v1761_v57, %v1760_v2  ;;  %v1819_v17 = vpop.permute.xlu0 %1818 }
 0x434   :  { %v1829_v44 = vmul.f32 %v2216_v36, %v1819_v17  ;;  %v1821_v45 = vpop.permute.xlu1 %1820 }
 0x435   :  { %v1830_v39 = vmul.f32 %v2216_v36, %v1821_v45  ;;  %2729 = vmatpush3.bf16.msra.mxu0 %v2728_v8 }
 0x437   :  { %v2730_v34 = vpack.c.bf16 %v1830_v39, %v1829_v44  ;;  %v1752_v48 = vpop.permute.xlu0 %1751 }
 0x438   :  { %v1762_v25 = vmul.f32 %v2213_v28, %v1752_v48  ;;  %v1754_v63 = vpop.permute.xlu1 %1753 }
 0x439   :  { %v1763_v33 = vmul.f32 %v2213_v28, %v1754_v63  ;;  %2731 = vmatprep.subr.bf16.mxu0 %v2730_v34 }
 0x43b   :  { %v2732_v19 = vpack.c.bf16 %v1763_v33, %v1762_v25  ;;  %v1836_v37 = vpop.permute.xlu0 %1835 }
 0x43c   :  { %v1848_v49 = vmul.f32 %v2217_v12, %v1836_v37  ;;  %v1838_v53 = vpop.permute.xlu1 %1837 }
 0x43d   :  { %v1849_v3 = vmul.f32 %v2217_v12, %v1838_v53  ;;  %2733 = vmatpush3.bf16.msra.mxu0 %v2732_v19 }
 0x43f   :  { %v2734_v47 = vpack.c.bf16 %v1849_v3, %v1848_v49  ;;  %v1769_v50 = vpop.permute.xlu0 %1768 }
 0x440   :  { %v1781_v55 = vmul.f32 %v2214_v54, %v1769_v50  ;;  %v1771_v56 = vpop.permute.xlu1 %1770 }
 0x441   :  { %v1782_v58 = vmul.f32 %v2214_v54, %v1771_v56  ;;  %2735 = vmatprep.subr.bf16.mxu0 %v2734_v47 }
 0x443   :  { %v2736_v46 = vpack.c.bf16 %v1782_v58, %v1781_v55  ;;  %v1840_v6 = vpop.permute.xlu0 %1839 }
 0x444   :  { %v1850_v59 = vmul.f32 %v2217_v12, %v1840_v6  ;;  %v1842_v60 = vpop.permute.xlu1 %1841 }
 0x445   :  { %v1851_v51 = vmul.f32 %v2217_v12, %v1842_v60  ;;  %2737 = vmatpush3.bf16.msra.mxu0 %v2736_v46 }
 0x447   :  { %v2738_v61 = vpack.c.bf16 %v1851_v51, %v1850_v59  ;;  %v1773_v35 = vpop.permute.xlu0 %1772 }
 0x448   :  { %v1783_v29 = vmul.f32 %v2214_v54, %v1773_v35  ;;  %v1775_v4 = vpop.permute.xlu1 %1774 }
 0x449   :  { %v1784_v5 = vmul.f32 %v2214_v54, %v1775_v4  ;;  %2739 = vmatprep.subr.bf16.mxu0 %v2738_v61 }
 0x44b   :  { %v2740_v15 = vpack.c.bf16 %v1784_v5, %v1783_v29  ;;  %v1857_v9 = vpop.permute.xlu0 %1856 }
 0x44c   :  { %v1869_v0 = vmul.f32 %v2218_v62, %v1857_v9  ;;  %v1859_v10 = vpop.permute.xlu1 %1858 }
 0x44d   :  { %v1870_v20 = vmul.f32 %v2218_v62, %v1859_v10  ;;  %2741 = vmatpush3.bf16.msra.mxu0 %v2740_v15 }
 0x44f   :  { %v2742_v42 = vpack.c.bf16 %v1870_v20, %v1869_v0  ;;  %v1861_v7 = vpop.permute.xlu0 %1860 }
 0x450   :  { %v1871_v52 = vmul.f32 %v2218_v62, %v1861_v7  ;;  %v1863_v14 = vpop.permute.xlu1 %1862  ;;  %2003 = vmatmul.mubr.f32.vlgmr.msra.gmra.mrb[6].mxu0 %v1877_v11 }
 0x451   :  { %v1872_v16 = vmul.f32 %v2218_v62, %v1863_v14  ;;  %2743 = vmatprep.subr.bf16.mxu0 %v2742_v42  ;;  %2007 = vmatprep.mubr.f32.mxu0 %v1881_v13 }
 0x452   :  { %2745 = vmatpush3.bf16.msra.mxu0 %v2742_v42 }
 0x453   :  { %v2746_v26 = vpack.c.bf16 %v1872_v16, %v1871_v52 }
 0x454   :  { %2008 = vmatmul.mubr.f32.gmra.mrb[8].mxu0 %v1880_v18 }
 0x455   :  { %2747 = vmatprep.subr.bf16.mxu0 %v2746_v26  ;;  %2350 = vmatprep.mubr.msk.f32.mxu0 %vm1931_vm4, %v1879_v22 }
 0x456   :  { %2749 = vmatpush3.bf16.msra.mxu0 %v2746_v26 }
 0x459   :  { %2351 = vmatmul.mubr.msk.f32.vlgmr.msra.gmra.mrb[10].mxu0 %vm1931_vm4, %v1882_v24 }
 0x460   :  { %v1924_v28 = vpop.permute.xlu0 %1923 }
 0x461   :  { %v1929_v21 = vpop.permute.xlu1 %1928 }
 0x523   :  { %v2327_v30 = vpop.f32.mrb[6].mxu0 }
 0x524   :  { %v2328_v36 = vpop.f32.mrb[7].mxu0 }
 0x525   :  { %v2329_v31 = vadd.f32 %v2328_v36, %v2327_v30 }
 0x527   :  { %v2330_v23 = vpop.f32.mrb[8].mxu0  ;;  %v2005_v2 = vadd.f32 %v2329_v31, %v1924_v28 }
 0x528   :  { %v2331_v41 = vpop.f32.mrb[9].mxu0 }
 0x529   :  { %v2332_v43 = vadd.f32 %v2331_v41, %v2330_v23 }
 0x52b   :  { %v2010_v38 = vadd.f32 %v2332_v43, %v1929_v21 }
 0x52c   :  { %v2352_v1 = vpop.f32.mrb[10].mxu0 }
 0x52d   :  { %v2085_v40 = vadd.f32 %v2352_v1, %v2010_v38  ;;  %v2079_v57 = vpop.f32.mrb[11].mxu0 }
 0x52e   :  { %v2080_v8 = vadd.f32 %v2079_v57, %v2005_v2 }
 0x52f   :  { %v2091_v17 = vmul.f32 0.2, %v2085_v40  ;;  %vm2089_vm5 = vcmp.ge.f32.partialorder %v2085_v40, 0.0 }
 0x530   :  { %v2090_v44 = vmul.f32 0.2, %v2080_v8  ;;  %vm2088_vm6 = vcmp.ge.f32.partialorder %v2080_v8, 0.0 }
 0x531   :  { %v2093_v45 = vsel %vm2089_vm5, %v2085_v40, %v2091_v17 }
 0x532   :  { %v2222_v39 = vclamps-f32 %v2093_v45, 181.01933  ;;  %v2092_v34 = vsel %vm2088_vm6, %v2080_v8, %v2090_v44 }
 0x533   :  { %v2221_v48 = vclamps-f32 %v2092_v34, 181.01933 }
 0x534   :  { %v2177_v25 = vadd.f32 %v2357_v32, %v2222_v39 }
 0x535   :  { %v2172_v63 = vadd.f32 %v2221_v48, %v2171_v27 }
 0x536   :  { %2181 = vst [vmem:[%s3746_s12 + $0x8] sm:$0xff] %v2177_v25 }
 0x537   :  { %2180 = vst [vmem:[%s3746_s12] sm:$0xff] %v2172_v63 }
 0x538   :  { %2186 = vsyncpa [#allocation5], 1 }
 0x539   :  { %2187 = vsyncpa [#allocation7], 1 }

</bundles_post_ra>
